<compile_context>
chip_gen: v7x
topology: tpu7x:2x2x1
jax: 0.10.0
libtpu: 0.0.40
codegen_flags: <defaults>
</compile_context>

<pallas_src>
import functools

import jax
import jax.numpy as jnp
from jax import lax
from jax.experimental import pallas as pl
from jax.experimental.pallas import tpu as pltpu


_UNROLL_SEQ_MAX = 64   # fully unroll (and keep gi in vregs) up to this many steps


def _round_up(x, m):
    return ((x + m - 1) // m) * m


def _gate_math(gi, gh_r, gh_z, gh_n, bhn, h):
    """Shared gate math; gi is (M, 3*GP) with gates at lane offsets 0/GP/2GP."""
    GP = gh_r.shape[-1]
    r = jax.nn.sigmoid(gi[:, 0:GP] + gh_r)
    z = jax.nn.sigmoid(gi[:, GP:2 * GP] + gh_z)
    n = jnp.tanh(gi[:, 2 * GP:3 * GP] + r * (gh_n + bhn))
    return (1.0 - z) * n + z * h


def _gru_kernel_unrolled(x_ref, wih_ref, whh_ref, bfold_ref, bhn_ref, hn_ref,
                         *, seq, b_pad, gate_pad):
    """Small-seq path: gi held as a value, fully unrolled, static row slices."""
    GP = gate_pad

    # Prologue: input projection for all timesteps x batch rows in one matmul.
    # bfold already contains b_ih (all gates) + b_hh (r, z gates only).
    gi_all = (
        jnp.dot(x_ref[...], wih_ref[...], preferred_element_type=jnp.float32)
        + bfold_ref[...]
    )                                                     # (seq*b_pad, 3*GP)

    bhn = bhn_ref[...]                                    # (1, GP) padded b_hn
    h = jnp.zeros((b_pad, GP), jnp.float32)               # pad lanes stay 0

    for t in range(seq):                                  # static, fully unrolled
        gi = gi_all[t * b_pad:(t + 1) * b_pad, :]         # static sublane slice
        # Three per-gate MXU products (r, z, n); r/z sigmoids can start while
        # the n product is still in flight.
        gh_r = jnp.dot(h, whh_ref[:, 0:GP], preferred_element_type=jnp.float32)
        gh_z = jnp.dot(h, whh_ref[:, GP:2 * GP], preferred_element_type=jnp.float32)
        gh_n = jnp.dot(h, whh_ref[:, 2 * GP:3 * GP], preferred_element_type=jnp.float32)
        h = _gate_math(gi, gh_r, gh_z, gh_n, bhn, h)

    # Unconditional, lane/sublane-dense (unmasked) store; wrapper slices [:B,:H].
    hn_ref[...] = h


def _gru_kernel_looped(x_ref, wih_ref, whh_ref, bfold_ref, bhn_ref, hn_ref,
                       gi_ref, *, seq, b_pad, gate_pad, unroll):
    """Large-seq fallback: gi in VMEM scratch, fori_loop with modest unroll."""
    GP = gate_pad

    gi_ref[...] = (
        jnp.dot(x_ref[...], wih_ref[...], preferred_element_type=jnp.float32)
        + bfold_ref[...]
    )
    bhn = bhn_ref[...]

    def step(t, h):
        row = pl.multiple_of(t * b_pad, b_pad)
        gi = gi_ref[pl.ds(row, b_pad), :]                 # (b_pad, 3*GP)
        gh_r = jnp.dot(h, whh_ref[:, 0:GP], preferred_element_type=jnp.float32)
        gh_z = jnp.dot(h, whh_ref[:, GP:2 * GP], preferred_element_type=jnp.float32)
        gh_n = jnp.dot(h, whh_ref[:, 2 * GP:3 * GP], preferred_element_type=jnp.float32)
        return _gate_math(gi, gh_r, gh_z, gh_n, bhn, h)

    h0 = jnp.zeros((b_pad, GP), jnp.float32)
    hn_ref[...] = lax.fori_loop(0, seq, step, h0, unroll=unroll)


def _gru_forward_batched(x_bt, w_ih, w_hh, b_ih, b_hh, hidden_size):
    """x_bt: (B, seq, obs_dim) -> (B, hidden_size). Independent sequences share
    one kernel call by filling the M (sublane) dimension of the recurrence."""
    B, seq, obs_dim = x_bt.shape
    H = hidden_size

    GP = _round_up(H, 128)                                # lane-padded gate width
    obs_pad = _round_up(obs_dim, 128)
    b_pad = _round_up(max(B, 1), 8)                       # sublane-padded batch

    x_bt = x_bt.astype(jnp.float32)
    w_ih = w_ih.astype(jnp.float32)                       # (3H, obs_dim), gates [r, z, n]
    w_hh = w_hh.astype(jnp.float32)                       # (3H, H)
    b_ih = b_ih.astype(jnp.float32)
    b_hh = b_hh.astype(jnp.float32)

    # Time-major row layout: row t*b_pad + b holds sequence b at timestep t.
    x_pad = jnp.zeros((seq, b_pad, obs_pad), jnp.float32)
    x_pad = x_pad.at[:, :B, :obs_dim].set(jnp.transpose(x_bt, (1, 0, 2)))
    x_pad = x_pad.reshape(seq * b_pad, obs_pad)

    # Weights pre-transposed, each gate at a 128-lane-aligned column offset.
    # Pad rows/cols of whh_pad must stay exactly zero (pad-lane invariant).
    wih_pad = jnp.zeros((obs_pad, 3 * GP), jnp.float32)
    whh_pad = jnp.zeros((GP, 3 * GP), jnp.float32)
    for g in range(3):
        wih_pad = wih_pad.at[:obs_dim, g * GP:g * GP + H].set(w_ih[g * H:(g + 1) * H, :].T)
        whh_pad = whh_pad.at[:H, g * GP:g * GP + H].set(w_hh[g * H:(g + 1) * H, :].T)

    # Fold biases: b_ih (all gates) + b_hh (r, z); keep b_hn separate (it goes
    # inside r * (W_hn h + b_hn) in torch's GRU).
    bfold = jnp.zeros((1, 3 * GP), jnp.float32)
    bfold = bfold.at[0, 0:H].set(b_ih[0:H] + b_hh[0:H])
    bfold = bfold.at[0, GP:GP + H].set(b_ih[H:2 * H] + b_hh[H:2 * H])
    bfold = bfold.at[0, 2 * GP:2 * GP + H].set(b_ih[2 * H:3 * H])
    bhn = jnp.zeros((1, GP), jnp.float32).at[0, 0:H].set(b_hh[2 * H:3 * H])

    if seq <= _UNROLL_SEQ_MAX:
        kernel = functools.partial(_gru_kernel_unrolled,
                                   seq=seq, b_pad=b_pad, gate_pad=GP)
        scratch = []
    else:
        kernel = functools.partial(_gru_kernel_looped,
                                   seq=seq, b_pad=b_pad, gate_pad=GP, unroll=8)
        scratch = [pltpu.VMEM((seq * b_pad, 3 * GP), jnp.float32)]

    hn_pad = pl.pallas_call(
        kernel,
        out_shape=jax.ShapeDtypeStruct((b_pad, GP), jnp.float32),  # dense store
        in_specs=[pl.BlockSpec(memory_space=pltpu.MemorySpace.VMEM)] * 5,
        out_specs=pl.BlockSpec(memory_space=pltpu.MemorySpace.VMEM),
        scratch_shapes=scratch,
    )(x_pad, wih_pad, whh_pad, bfold, bhn)

    return hn_pad[:B, :H]                                  # (B, H)


def gru_encoder_forward(nodes, w_ih, w_hh, b_ih, b_hh, hidden_size):
    """Module-equivalent forward: nodes (num_nodes, *feat) -> hn (1, 1, hidden)."""
    seq = nodes.shape[0]
    x = nodes.reshape(seq, -1).astype(jnp.float32)[None]   # (1, seq, obs_dim)
    hn = _gru_forward_batched(x, w_ih, w_hh, b_ih, b_hh, hidden_size)
    return hn.reshape(1, 1, hidden_size)                   # (num_layers=1, batch=1, H)


def gru_encoder_forward_multi(nodes_batch, w_ih, w_hh, b_ih, b_hh, hidden_size):
    """Batched extension: encode B independent graphs in one kernel call.
    nodes_batch: (B, num_nodes, *feat) -> (1, B, hidden_size)."""
    B, seq = nodes_batch.shape[0], nodes_batch.shape[1]
    x = nodes_batch.reshape(B, seq, -1).astype(jnp.float32)
    hn = _gru_forward_batched(x, w_ih, w_hh, b_ih, b_hh, hidden_size)
    return hn.reshape(1, B, hidden_size)


def gru_reference(nodes, w_ih, w_hh, b_ih, b_hh, hidden_size):
    """Pure-JAX reference (lax.scan) of torch.nn.GRU, for correctness check."""
    seq = nodes.shape[0]
    x = nodes.reshape(seq, -1).astype(jnp.float32)
    H = hidden_size

    def step(h, x_t):
        gi = x_t @ w_ih.T + b_ih
        gh = h @ w_hh.T + b_hh
        i_r, i_z, i_n = gi[:H], gi[H:2 * H], gi[2 * H:]
        h_r, h_z, h_n = gh[:H], gh[H:2 * H], gh[2 * H:]
        r = jax.nn.sigmoid(i_r + h_r)
        z = jax.nn.sigmoid(i_z + h_z)
        n = jnp.tanh(i_n + r * h_n)
        h_new = (1.0 - z) * n + z * h
        return h_new, None

    h0 = jnp.zeros((H,), jnp.float32)
    h_final, _ = jax.lax.scan(step, h0, x)
    return h_final.reshape(1, 1, H)


if __name__ == "__main__":
    # Small shapes: 8 object nodes, 16-dim node features, hidden_size=32.
    seq, obs_dim, hidden_size = 8, 16, 32

    key = jax.random.PRNGKey(0)
    k_nodes, k_batch, k_wih, k_whh, k_bih, k_bhh = jax.random.split(key, 6)

    nodes = jax.random.normal(k_nodes, (seq, obs_dim), dtype=jnp.float32)

    # Deterministic GRU parameters (torch uses U(-1/sqrt(H), 1/sqrt(H))).
    bound = 1.0 / (hidden_size ** 0.5)
    w_ih = jax.random.uniform(k_wih, (3 * hidden_size, obs_dim),
                              minval=-bound, maxval=bound, dtype=jnp.float32)
    w_hh = jax.random.uniform(k_whh, (3 * hidden_size, hidden_size),
                              minval=-bound, maxval=bound, dtype=jnp.float32)
    b_ih = jax.random.uniform(k_bih, (3 * hidden_size,),
                              minval=-bound, maxval=bound, dtype=jnp.float32)
    b_hh = jax.random.uniform(k_bhh, (3 * hidden_size,),
                              minval=-bound, maxval=bound, dtype=jnp.float32)

    # Module-equivalent single-sequence forward.
    hn = gru_encoder_forward(nodes, w_ih, w_hh, b_ih, b_hh, hidden_size)
    hn = jax.block_until_ready(hn)
    hn_ref = gru_reference(nodes, w_ih, w_hh, b_ih, b_hh, hidden_size)
    assert hn.shape == (1, 1, hidden_size)
    assert jnp.allclose(hn, hn_ref, atol=1e-5, rtol=1e-5), "mismatch vs reference GRU"

    # Batched extension: 3 independent graphs share the M (sublane) dimension.
    nodes_batch = jax.random.normal(k_batch, (3, seq, obs_dim), dtype=jnp.float32)
    hn_b = gru_encoder_forward_multi(nodes_batch, w_ih, w_hh, b_ih, b_hh, hidden_size)
    hn_b = jax.block_until_ready(hn_b)
    for b in range(3):
        ref_b = gru_reference(nodes_batch[b], w_ih, w_hh, b_ih, b_hh, hidden_size)
        assert jnp.allclose(hn_b[0, b], ref_b[0, 0], atol=1e-5, rtol=1e-5), \
            f"batched mismatch vs reference GRU at b={b}"

    print("KERNEL_OK")
</pallas_src>

<mosaic_0001>
module attributes {stable_mosaic.version = 11 : i64} {
  func.func @_gru_kernel_unrolled(%arg0: memref<64x128xf32, #tpu.memory_space<vmem>>, %arg1: memref<128x384xf32, #tpu.memory_space<vmem>>, %arg2: memref<128x384xf32, #tpu.memory_space<vmem>>, %arg3: memref<1x384xf32, #tpu.memory_space<vmem>>, %arg4: memref<1x128xf32, #tpu.memory_space<vmem>>, %arg5: memref<8x128xf32, #tpu.memory_space<vmem>>) attributes {dimension_semantics = [], scalar_prefetch = 0 : i64, scratch_operands = 0 : i64, tpu.core_type = #tpu.core_type<tc>} {
    %c0 = arith.constant 0 : index
    %c0_0 = arith.constant 0 : index
    %0 = vector.load %arg0[%c0, %c0_0] : memref<64x128xf32, #tpu.memory_space<vmem>>, vector<64x128xf32>
    %c0_1 = arith.constant 0 : index
    %c0_2 = arith.constant 0 : index
    %1 = vector.load %arg1[%c0_1, %c0_2] : memref<128x384xf32, #tpu.memory_space<vmem>>, vector<128x384xf32>
    %cst = arith.constant dense<0.000000e+00> : vector<64x384xf32>
    %2 = tpu.matmul %0, %1, %cst {dimension_numbers = #tpu.dot_dimension_numbers<[1], [0], [0], [1], [0, 0, 1, 1], [], []>} : vector<64x128xf32>, vector<128x384xf32>, vector<64x384xf32> -> vector<64x384xf32>
    %c0_3 = arith.constant 0 : index
    %c0_4 = arith.constant 0 : index
    %3 = vector.load %arg3[%c0_3, %c0_4] : memref<1x384xf32, #tpu.memory_space<vmem>>, vector<1x384xf32>
    %4 = vector.broadcast %3 : vector<1x384xf32> to vector<64x384xf32>
    %5 = arith.addf %2, %4 : vector<64x384xf32>
    %c0_5 = arith.constant 0 : index
    %c0_6 = arith.constant 0 : index
    %6 = vector.load %arg4[%c0_5, %c0_6] : memref<1x128xf32, #tpu.memory_space<vmem>>, vector<1x128xf32>
    %cst_7 = arith.constant 0.000000e+00 : f32
    %7 = vector.broadcast %cst_7 : f32 to vector<8x128xf32>
    %8 = vector.extract_strided_slice %5 {offsets = [0, 0], sizes = [8, 384], strides = [1, 1]} : vector<64x384xf32> to vector<8x384xf32>
    %c0_8 = arith.constant 0 : index
    %c0_9 = arith.constant 0 : index
    %9 = vector.load %arg2[%c0_8, %c0_9] : memref<128x384xf32, #tpu.memory_space<vmem>>, vector<128x128xf32>
    %cst_10 = arith.constant dense<0.000000e+00> : vector<8x128xf32>
    %10 = tpu.matmul %7, %9, %cst_10 {dimension_numbers = #tpu.dot_dimension_numbers<[1], [0], [0], [1], [0, 0, 1, 1], [], []>} : vector<8x128xf32>, vector<128x128xf32>, vector<8x128xf32> -> vector<8x128xf32>
    %c0_11 = arith.constant 0 : index
    %c128 = arith.constant 128 : index
    %11 = vector.load %arg2[%c0_11, %c128] : memref<128x384xf32, #tpu.memory_space<vmem>>, vector<128x128xf32>
    %cst_12 = arith.constant dense<0.000000e+00> : vector<8x128xf32>
    %12 = tpu.matmul %7, %11, %cst_12 {dimension_numbers = #tpu.dot_dimension_numbers<[1], [0], [0], [1], [0, 0, 1, 1], [], []>} : vector<8x128xf32>, vector<128x128xf32>, vector<8x128xf32> -> vector<8x128xf32>
    %c0_13 = arith.constant 0 : index
    %c256 = arith.constant 256 : index
    %13 = vector.load %arg2[%c0_13, %c256] : memref<128x384xf32, #tpu.memory_space<vmem>>, vector<128x128xf32>
    %cst_14 = arith.constant dense<0.000000e+00> : vector<8x128xf32>
    %14 = tpu.matmul %7, %13, %cst_14 {dimension_numbers = #tpu.dot_dimension_numbers<[1], [0], [0], [1], [0, 0, 1, 1], [], []>} : vector<8x128xf32>, vector<128x128xf32>, vector<8x128xf32> -> vector<8x128xf32>
    %15 = vector.extract_strided_slice %8 {offsets = [0, 0], sizes = [8, 128], strides = [1, 1]} : vector<8x384xf32> to vector<8x128xf32>
    %16 = arith.addf %15, %10 : vector<8x128xf32>
    %17 = arith.negf %16 : vector<8x128xf32>
    %18 = math.exp %17 : vector<8x128xf32>
    %cst_15 = arith.constant 1.000000e+00 : f32
    %19 = vector.broadcast %cst_15 : f32 to vector<8x128xf32>
    %20 = arith.addf %19, %18 : vector<8x128xf32>
    %21 = arith.divf %19, %20 : vector<8x128xf32>
    %22 = vector.extract_strided_slice %8 {offsets = [0, 128], sizes = [8, 128], strides = [1, 1]} : vector<8x384xf32> to vector<8x128xf32>
    %23 = arith.addf %22, %12 : vector<8x128xf32>
    %24 = arith.negf %23 : vector<8x128xf32>
    %25 = math.exp %24 : vector<8x128xf32>
    %cst_16 = arith.constant 1.000000e+00 : f32
    %26 = vector.broadcast %cst_16 : f32 to vector<8x128xf32>
    %27 = arith.addf %26, %25 : vector<8x128xf32>
    %28 = arith.divf %26, %27 : vector<8x128xf32>
    %29 = vector.extract_strided_slice %8 {offsets = [0, 256], sizes = [8, 128], strides = [1, 1]} : vector<8x384xf32> to vector<8x128xf32>
    %30 = vector.broadcast %6 : vector<1x128xf32> to vector<8x128xf32>
    %31 = arith.addf %14, %30 : vector<8x128xf32>
    %32 = arith.mulf %21, %31 : vector<8x128xf32>
    %33 = arith.addf %29, %32 : vector<8x128xf32>
    %34 = math.tanh %33 : vector<8x128xf32>
    %cst_17 = arith.constant 1.000000e+00 : f32
    %35 = vector.broadcast %cst_17 : f32 to vector<8x128xf32>
    %36 = arith.subf %35, %28 : vector<8x128xf32>
    %37 = arith.mulf %36, %34 : vector<8x128xf32>
    %38 = arith.mulf %28, %7 : vector<8x128xf32>
    %39 = arith.addf %37, %38 : vector<8x128xf32>
    %40 = vector.extract_strided_slice %5 {offsets = [8, 0], sizes = [8, 384], strides = [1, 1]} : vector<64x384xf32> to vector<8x384xf32>
    %c0_18 = arith.constant 0 : index
    %c0_19 = arith.constant 0 : index
    %41 = vector.load %arg2[%c0_18, %c0_19] : memref<128x384xf32, #tpu.memory_space<vmem>>, vector<128x128xf32>
    %cst_20 = arith.constant dense<0.000000e+00> : vector<8x128xf32>
    %42 = tpu.matmul %39, %41, %cst_20 {dimension_numbers = #tpu.dot_dimension_numbers<[1], [0], [0], [1], [0, 0, 1, 1], [], []>} : vector<8x128xf32>, vector<128x128xf32>, vector<8x128xf32> -> vector<8x128xf32>
    %c0_21 = arith.constant 0 : index
    %c128_22 = arith.constant 128 : index
    %43 = vector.load %arg2[%c0_21, %c128_22] : memref<128x384xf32, #tpu.memory_space<vmem>>, vector<128x128xf32>
    %cst_23 = arith.constant dense<0.000000e+00> : vector<8x128xf32>
    %44 = tpu.matmul %39, %43, %cst_23 {dimension_numbers = #tpu.dot_dimension_numbers<[1], [0], [0], [1], [0, 0, 1, 1], [], []>} : vector<8x128xf32>, vector<128x128xf32>, vector<8x128xf32> -> vector<8x128xf32>
    %c0_24 = arith.constant 0 : index
    %c256_25 = arith.constant 256 : index
    %45 = vector.load %arg2[%c0_24, %c256_25] : memref<128x384xf32, #tpu.memory_space<vmem>>, vector<128x128xf32>
    %cst_26 = arith.constant dense<0.000000e+00> : vector<8x128xf32>
    %46 = tpu.matmul %39, %45, %cst_26 {dimension_numbers = #tpu.dot_dimension_numbers<[1], [0], [0], [1], [0, 0, 1, 1], [], []>} : vector<8x128xf32>, vector<128x128xf32>, vector<8x128xf32> -> vector<8x128xf32>
    %47 = vector.extract_strided_slice %40 {offsets = [0, 0], sizes = [8, 128], strides = [1, 1]} : vector<8x384xf32> to vector<8x128xf32>
    %48 = arith.addf %47, %42 : vector<8x128xf32>
    %49 = arith.negf %48 : vector<8x128xf32>
    %50 = math.exp %49 : vector<8x128xf32>
    %cst_27 = arith.constant 1.000000e+00 : f32
    %51 = vector.broadcast %cst_27 : f32 to vector<8x128xf32>
    %52 = arith.addf %51, %50 : vector<8x128xf32>
    %53 = arith.divf %51, %52 : vector<8x128xf32>
    %54 = vector.extract_strided_slice %40 {offsets = [0, 128], sizes = [8, 128], strides = [1, 1]} : vector<8x384xf32> to vector<8x128xf32>
    %55 = arith.addf %54, %44 : vector<8x128xf32>
    %56 = arith.negf %55 : vector<8x128xf32>
    %57 = math.exp %56 : vector<8x128xf32>
    %cst_28 = arith.constant 1.000000e+00 : f32
    %58 = vector.broadcast %cst_28 : f32 to vector<8x128xf32>
    %59 = arith.addf %58, %57 : vector<8x128xf32>
    %60 = arith.divf %58, %59 : vector<8x128xf32>
    %61 = vector.extract_strided_slice %40 {offsets = [0, 256], sizes = [8, 128], strides = [1, 1]} : vector<8x384xf32> to vector<8x128xf32>
    %62 = vector.broadcast %6 : vector<1x128xf32> to vector<8x128xf32>
    %63 = arith.addf %46, %62 : vector<8x128xf32>
    %64 = arith.mulf %53, %63 : vector<8x128xf32>
    %65 = arith.addf %61, %64 : vector<8x128xf32>
    %66 = math.tanh %65 : vector<8x128xf32>
    %cst_29 = arith.constant 1.000000e+00 : f32
    %67 = vector.broadcast %cst_29 : f32 to vector<8x128xf32>
    %68 = arith.subf %67, %60 : vector<8x128xf32>
    %69 = arith.mulf %68, %66 : vector<8x128xf32>
    %70 = arith.mulf %60, %39 : vector<8x128xf32>
    %71 = arith.addf %69, %70 : vector<8x128xf32>
    %72 = vector.extract_strided_slice %5 {offsets = [16, 0], sizes = [8, 384], strides = [1, 1]} : vector<64x384xf32> to vector<8x384xf32>
    %c0_30 = arith.constant 0 : index
    %c0_31 = arith.constant 0 : index
    %73 = vector.load %arg2[%c0_30, %c0_31] : memref<128x384xf32, #tpu.memory_space<vmem>>, vector<128x128xf32>
    %cst_32 = arith.constant dense<0.000000e+00> : vector<8x128xf32>
    %74 = tpu.matmul %71, %73, %cst_32 {dimension_numbers = #tpu.dot_dimension_numbers<[1], [0], [0], [1], [0, 0, 1, 1], [], []>} : vector<8x128xf32>, vector<128x128xf32>, vector<8x128xf32> -> vector<8x128xf32>
    %c0_33 = arith.constant 0 : index
    %c128_34 = arith.constant 128 : index
    %75 = vector.load %arg2[%c0_33, %c128_34] : memref<128x384xf32, #tpu.memory_space<vmem>>, vector<128x128xf32>
    %cst_35 = arith.constant dense<0.000000e+00> : vector<8x128xf32>
    %76 = tpu.matmul %71, %75, %cst_35 {dimension_numbers = #tpu.dot_dimension_numbers<[1], [0], [0], [1], [0, 0, 1, 1], [], []>} : vector<8x128xf32>, vector<128x128xf32>, vector<8x128xf32> -> vector<8x128xf32>
    %c0_36 = arith.constant 0 : index
    %c256_37 = arith.constant 256 : index
    %77 = vector.load %arg2[%c0_36, %c256_37] : memref<128x384xf32, #tpu.memory_space<vmem>>, vector<128x128xf32>
    %cst_38 = arith.constant dense<0.000000e+00> : vector<8x128xf32>
    %78 = tpu.matmul %71, %77, %cst_38 {dimension_numbers = #tpu.dot_dimension_numbers<[1], [0], [0], [1], [0, 0, 1, 1], [], []>} : vector<8x128xf32>, vector<128x128xf32>, vector<8x128xf32> -> vector<8x128xf32>
    %79 = vector.extract_strided_slice %72 {offsets = [0, 0], sizes = [8, 128], strides = [1, 1]} : vector<8x384xf32> to vector<8x128xf32>
    %80 = arith.addf %79, %74 : vector<8x128xf32>
    %81 = arith.negf %80 : vector<8x128xf32>
    %82 = math.exp %81 : vector<8x128xf32>
    %cst_39 = arith.constant 1.000000e+00 : f32
    %83 = vector.broadcast %cst_39 : f32 to vector<8x128xf32>
    %84 = arith.addf %83, %82 : vector<8x128xf32>
    %85 = arith.divf %83, %84 : vector<8x128xf32>
    %86 = vector.extract_strided_slice %72 {offsets = [0, 128], sizes = [8, 128], strides = [1, 1]} : vector<8x384xf32> to vector<8x128xf32>
    %87 = arith.addf %86, %76 : vector<8x128xf32>
    %88 = arith.negf %87 : vector<8x128xf32>
    %89 = math.exp %88 : vector<8x128xf32>
    %cst_40 = arith.constant 1.000000e+00 : f32
    %90 = vector.broadcast %cst_40 : f32 to vector<8x128xf32>
    %91 = arith.addf %90, %89 : vector<8x128xf32>
    %92 = arith.divf %90, %91 : vector<8x128xf32>
    %93 = vector.extract_strided_slice %72 {offsets = [0, 256], sizes = [8, 128], strides = [1, 1]} : vector<8x384xf32> to vector<8x128xf32>
    %94 = vector.broadcast %6 : vector<1x128xf32> to vector<8x128xf32>
    %95 = arith.addf %78, %94 : vector<8x128xf32>
    %96 = arith.mulf %85, %95 : vector<8x128xf32>
    %97 = arith.addf %93, %96 : vector<8x128xf32>
    %98 = math.tanh %97 : vector<8x128xf32>
    %cst_41 = arith.constant 1.000000e+00 : f32
    %99 = vector.broadcast %cst_41 : f32 to vector<8x128xf32>
    %100 = arith.subf %99, %92 : vector<8x128xf32>
    %101 = arith.mulf %100, %98 : vector<8x128xf32>
    %102 = arith.mulf %92, %71 : vector<8x128xf32>
    %103 = arith.addf %101, %102 : vector<8x128xf32>
    %104 = vector.extract_strided_slice %5 {offsets = [24, 0], sizes = [8, 384], strides = [1, 1]} : vector<64x384xf32> to vector<8x384xf32>
    %c0_42 = arith.constant 0 : index
    %c0_43 = arith.constant 0 : index
    %105 = vector.load %arg2[%c0_42, %c0_43] : memref<128x384xf32, #tpu.memory_space<vmem>>, vector<128x128xf32>
    %cst_44 = arith.constant dense<0.000000e+00> : vector<8x128xf32>
    %106 = tpu.matmul %103, %105, %cst_44 {dimension_numbers = #tpu.dot_dimension_numbers<[1], [0], [0], [1], [0, 0, 1, 1], [], []>} : vector<8x128xf32>, vector<128x128xf32>, vector<8x128xf32> -> vector<8x128xf32>
    %c0_45 = arith.constant 0 : index
    %c128_46 = arith.constant 128 : index
    %107 = vector.load %arg2[%c0_45, %c128_46] : memref<128x384xf32, #tpu.memory_space<vmem>>, vector<128x128xf32>
    %cst_47 = arith.constant dense<0.000000e+00> : vector<8x128xf32>
    %108 = tpu.matmul %103, %107, %cst_47 {dimension_numbers = #tpu.dot_dimension_numbers<[1], [0], [0], [1], [0, 0, 1, 1], [], []>} : vector<8x128xf32>, vector<128x128xf32>, vector<8x128xf32> -> vector<8x128xf32>
    %c0_48 = arith.constant 0 : index
    %c256_49 = arith.constant 256 : index
    %109 = vector.load %arg2[%c0_48, %c256_49] : memref<128x384xf32, #tpu.memory_space<vmem>>, vector<128x128xf32>
    %cst_50 = arith.constant dense<0.000000e+00> : vector<8x128xf32>
    %110 = tpu.matmul %103, %109, %cst_50 {dimension_numbers = #tpu.dot_dimension_numbers<[1], [0], [0], [1], [0, 0, 1, 1], [], []>} : vector<8x128xf32>, vector<128x128xf32>, vector<8x128xf32> -> vector<8x128xf32>
    %111 = vector.extract_strided_slice %104 {offsets = [0, 0], sizes = [8, 128], strides = [1, 1]} : vector<8x384xf32> to vector<8x128xf32>
    %112 = arith.addf %111, %106 : vector<8x128xf32>
    %113 = arith.negf %112 : vector<8x128xf32>
    %114 = math.exp %113 : vector<8x128xf32>
    %cst_51 = arith.constant 1.000000e+00 : f32
    %115 = vector.broadcast %cst_51 : f32 to vector<8x128xf32>
    %116 = arith.addf %115, %114 : vector<8x128xf32>
    %117 = arith.divf %115, %116 : vector<8x128xf32>
    %118 = vector.extract_strided_slice %104 {offsets = [0, 128], sizes = [8, 128], strides = [1, 1]} : vector<8x384xf32> to vector<8x128xf32>
    %119 = arith.addf %118, %108 : vector<8x128xf32>
    %120 = arith.negf %119 : vector<8x128xf32>
    %121 = math.exp %120 : vector<8x128xf32>
    %cst_52 = arith.constant 1.000000e+00 : f32
    %122 = vector.broadcast %cst_52 : f32 to vector<8x128xf32>
    %123 = arith.addf %122, %121 : vector<8x128xf32>
    %124 = arith.divf %122, %123 : vector<8x128xf32>
    %125 = vector.extract_strided_slice %104 {offsets = [0, 256], sizes = [8, 128], strides = [1, 1]} : vector<8x384xf32> to vector<8x128xf32>
    %126 = vector.broadcast %6 : vector<1x128xf32> to vector<8x128xf32>
    %127 = arith.addf %110, %126 : vector<8x128xf32>
    %128 = arith.mulf %117, %127 : vector<8x128xf32>
    %129 = arith.addf %125, %128 : vector<8x128xf32>
    %130 = math.tanh %129 : vector<8x128xf32>
    %cst_53 = arith.constant 1.000000e+00 : f32
    %131 = vector.broadcast %cst_53 : f32 to vector<8x128xf32>
    %132 = arith.subf %131, %124 : vector<8x128xf32>
    %133 = arith.mulf %132, %130 : vector<8x128xf32>
    %134 = arith.mulf %124, %103 : vector<8x128xf32>
    %135 = arith.addf %133, %134 : vector<8x128xf32>
    %136 = vector.extract_strided_slice %5 {offsets = [32, 0], sizes = [8, 384], strides = [1, 1]} : vector<64x384xf32> to vector<8x384xf32>
    %c0_54 = arith.constant 0 : index
    %c0_55 = arith.constant 0 : index
    %137 = vector.load %arg2[%c0_54, %c0_55] : memref<128x384xf32, #tpu.memory_space<vmem>>, vector<128x128xf32>
    %cst_56 = arith.constant dense<0.000000e+00> : vector<8x128xf32>
    %138 = tpu.matmul %135, %137, %cst_56 {dimension_numbers = #tpu.dot_dimension_numbers<[1], [0], [0], [1], [0, 0, 1, 1], [], []>} : vector<8x128xf32>, vector<128x128xf32>, vector<8x128xf32> -> vector<8x128xf32>
    %c0_57 = arith.constant 0 : index
    %c128_58 = arith.constant 128 : index
    %139 = vector.load %arg2[%c0_57, %c128_58] : memref<128x384xf32, #tpu.memory_space<vmem>>, vector<128x128xf32>
    %cst_59 = arith.constant dense<0.000000e+00> : vector<8x128xf32>
    %140 = tpu.matmul %135, %139, %cst_59 {dimension_numbers = #tpu.dot_dimension_numbers<[1], [0], [0], [1], [0, 0, 1, 1], [], []>} : vector<8x128xf32>, vector<128x128xf32>, vector<8x128xf32> -> vector<8x128xf32>
    %c0_60 = arith.constant 0 : index
    %c256_61 = arith.constant 256 : index
    %141 = vector.load %arg2[%c0_60, %c256_61] : memref<128x384xf32, #tpu.memory_space<vmem>>, vector<128x128xf32>
    %cst_62 = arith.constant dense<0.000000e+00> : vector<8x128xf32>
    %142 = tpu.matmul %135, %141, %cst_62 {dimension_numbers = #tpu.dot_dimension_numbers<[1], [0], [0], [1], [0, 0, 1, 1], [], []>} : vector<8x128xf32>, vector<128x128xf32>, vector<8x128xf32> -> vector<8x128xf32>
    %143 = vector.extract_strided_slice %136 {offsets = [0, 0], sizes = [8, 128], strides = [1, 1]} : vector<8x384xf32> to vector<8x128xf32>
    %144 = arith.addf %143, %138 : vector<8x128xf32>
    %145 = arith.negf %144 : vector<8x128xf32>
    %146 = math.exp %145 : vector<8x128xf32>
    %cst_63 = arith.constant 1.000000e+00 : f32
    %147 = vector.broadcast %cst_63 : f32 to vector<8x128xf32>
    %148 = arith.addf %147, %146 : vector<8x128xf32>
    %149 = arith.divf %147, %148 : vector<8x128xf32>
    %150 = vector.extract_strided_slice %136 {offsets = [0, 128], sizes = [8, 128], strides = [1, 1]} : vector<8x384xf32> to vector<8x128xf32>
    %151 = arith.addf %150, %140 : vector<8x128xf32>
    %152 = arith.negf %151 : vector<8x128xf32>
    %153 = math.exp %152 : vector<8x128xf32>
    %cst_64 = arith.constant 1.000000e+00 : f32
    %154 = vector.broadcast %cst_64 : f32 to vector<8x128xf32>
    %155 = arith.addf %154, %153 : vector<8x128xf32>
    %156 = arith.divf %154, %155 : vector<8x128xf32>
    %157 = vector.extract_strided_slice %136 {offsets = [0, 256], sizes = [8, 128], strides = [1, 1]} : vector<8x384xf32> to vector<8x128xf32>
    %158 = vector.broadcast %6 : vector<1x128xf32> to vector<8x128xf32>
    %159 = arith.addf %142, %158 : vector<8x128xf32>
    %160 = arith.mulf %149, %159 : vector<8x128xf32>
    %161 = arith.addf %157, %160 : vector<8x128xf32>
    %162 = math.tanh %161 : vector<8x128xf32>
    %cst_65 = arith.constant 1.000000e+00 : f32
    %163 = vector.broadcast %cst_65 : f32 to vector<8x128xf32>
    %164 = arith.subf %163, %156 : vector<8x128xf32>
    %165 = arith.mulf %164, %162 : vector<8x128xf32>
    %166 = arith.mulf %156, %135 : vector<8x128xf32>
    %167 = arith.addf %165, %166 : vector<8x128xf32>
    %168 = vector.extract_strided_slice %5 {offsets = [40, 0], sizes = [8, 384], strides = [1, 1]} : vector<64x384xf32> to vector<8x384xf32>
    %c0_66 = arith.constant 0 : index
    %c0_67 = arith.constant 0 : index
    %169 = vector.load %arg2[%c0_66, %c0_67] : memref<128x384xf32, #tpu.memory_space<vmem>>, vector<128x128xf32>
    %cst_68 = arith.constant dense<0.000000e+00> : vector<8x128xf32>
    %170 = tpu.matmul %167, %169, %cst_68 {dimension_numbers = #tpu.dot_dimension_numbers<[1], [0], [0], [1], [0, 0, 1, 1], [], []>} : vector<8x128xf32>, vector<128x128xf32>, vector<8x128xf32> -> vector<8x128xf32>
    %c0_69 = arith.constant 0 : index
    %c128_70 = arith.constant 128 : index
    %171 = vector.load %arg2[%c0_69, %c128_70] : memref<128x384xf32, #tpu.memory_space<vmem>>, vector<128x128xf32>
    %cst_71 = arith.constant dense<0.000000e+00> : vector<8x128xf32>
    %172 = tpu.matmul %167, %171, %cst_71 {dimension_numbers = #tpu.dot_dimension_numbers<[1], [0], [0], [1], [0, 0, 1, 1], [], []>} : vector<8x128xf32>, vector<128x128xf32>, vector<8x128xf32> -> vector<8x128xf32>
    %c0_72 = arith.constant 0 : index
    %c256_73 = arith.constant 256 : index
    %173 = vector.load %arg2[%c0_72, %c256_73] : memref<128x384xf32, #tpu.memory_space<vmem>>, vector<128x128xf32>
    %cst_74 = arith.constant dense<0.000000e+00> : vector<8x128xf32>
    %174 = tpu.matmul %167, %173, %cst_74 {dimension_numbers = #tpu.dot_dimension_numbers<[1], [0], [0], [1], [0, 0, 1, 1], [], []>} : vector<8x128xf32>, vector<128x128xf32>, vector<8x128xf32> -> vector<8x128xf32>
    %175 = vector.extract_strided_slice %168 {offsets = [0, 0], sizes = [8, 128], strides = [1, 1]} : vector<8x384xf32> to vector<8x128xf32>
    %176 = arith.addf %175, %170 : vector<8x128xf32>
    %177 = arith.negf %176 : vector<8x128xf32>
    %178 = math.exp %177 : vector<8x128xf32>
    %cst_75 = arith.constant 1.000000e+00 : f32
    %179 = vector.broadcast %cst_75 : f32 to vector<8x128xf32>
    %180 = arith.addf %179, %178 : vector<8x128xf32>
    %181 = arith.divf %179, %180 : vector<8x128xf32>
    %182 = vector.extract_strided_slice %168 {offsets = [0, 128], sizes = [8, 128], strides = [1, 1]} : vector<8x384xf32> to vector<8x128xf32>
    %183 = arith.addf %182, %172 : vector<8x128xf32>
    %184 = arith.negf %183 : vector<8x128xf32>
    %185 = math.exp %184 : vector<8x128xf32>
    %cst_76 = arith.constant 1.000000e+00 : f32
    %186 = vector.broadcast %cst_76 : f32 to vector<8x128xf32>
    %187 = arith.addf %186, %185 : vector<8x128xf32>
    %188 = arith.divf %186, %187 : vector<8x128xf32>
    %189 = vector.extract_strided_slice %168 {offsets = [0, 256], sizes = [8, 128], strides = [1, 1]} : vector<8x384xf32> to vector<8x128xf32>
    %190 = vector.broadcast %6 : vector<1x128xf32> to vector<8x128xf32>
    %191 = arith.addf %174, %190 : vector<8x128xf32>
    %192 = arith.mulf %181, %191 : vector<8x128xf32>
    %193 = arith.addf %189, %192 : vector<8x128xf32>
    %194 = math.tanh %193 : vector<8x128xf32>
    %cst_77 = arith.constant 1.000000e+00 : f32
    %195 = vector.broadcast %cst_77 : f32 to vector<8x128xf32>
    %196 = arith.subf %195, %188 : vector<8x128xf32>
    %197 = arith.mulf %196, %194 : vector<8x128xf32>
    %198 = arith.mulf %188, %167 : vector<8x128xf32>
    %199 = arith.addf %197, %198 : vector<8x128xf32>
    %200 = vector.extract_strided_slice %5 {offsets = [48, 0], sizes = [8, 384], strides = [1, 1]} : vector<64x384xf32> to vector<8x384xf32>
    %c0_78 = arith.constant 0 : index
    %c0_79 = arith.constant 0 : index
    %201 = vector.load %arg2[%c0_78, %c0_79] : memref<128x384xf32, #tpu.memory_space<vmem>>, vector<128x128xf32>
    %cst_80 = arith.constant dense<0.000000e+00> : vector<8x128xf32>
    %202 = tpu.matmul %199, %201, %cst_80 {dimension_numbers = #tpu.dot_dimension_numbers<[1], [0], [0], [1], [0, 0, 1, 1], [], []>} : vector<8x128xf32>, vector<128x128xf32>, vector<8x128xf32> -> vector<8x128xf32>
    %c0_81 = arith.constant 0 : index
    %c128_82 = arith.constant 128 : index
    %203 = vector.load %arg2[%c0_81, %c128_82] : memref<128x384xf32, #tpu.memory_space<vmem>>, vector<128x128xf32>
    %cst_83 = arith.constant dense<0.000000e+00> : vector<8x128xf32>
    %204 = tpu.matmul %199, %203, %cst_83 {dimension_numbers = #tpu.dot_dimension_numbers<[1], [0], [0], [1], [0, 0, 1, 1], [], []>} : vector<8x128xf32>, vector<128x128xf32>, vector<8x128xf32> -> vector<8x128xf32>
    %c0_84 = arith.constant 0 : index
    %c256_85 = arith.constant 256 : index
    %205 = vector.load %arg2[%c0_84, %c256_85] : memref<128x384xf32, #tpu.memory_space<vmem>>, vector<128x128xf32>
    %cst_86 = arith.constant dense<0.000000e+00> : vector<8x128xf32>
    %206 = tpu.matmul %199, %205, %cst_86 {dimension_numbers = #tpu.dot_dimension_numbers<[1], [0], [0], [1], [0, 0, 1, 1], [], []>} : vector<8x128xf32>, vector<128x128xf32>, vector<8x128xf32> -> vector<8x128xf32>
    %207 = vector.extract_strided_slice %200 {offsets = [0, 0], sizes = [8, 128], strides = [1, 1]} : vector<8x384xf32> to vector<8x128xf32>
    %208 = arith.addf %207, %202 : vector<8x128xf32>
    %209 = arith.negf %208 : vector<8x128xf32>
    %210 = math.exp %209 : vector<8x128xf32>
    %cst_87 = arith.constant 1.000000e+00 : f32
    %211 = vector.broadcast %cst_87 : f32 to vector<8x128xf32>
    %212 = arith.addf %211, %210 : vector<8x128xf32>
    %213 = arith.divf %211, %212 : vector<8x128xf32>
    %214 = vector.extract_strided_slice %200 {offsets = [0, 128], sizes = [8, 128], strides = [1, 1]} : vector<8x384xf32> to vector<8x128xf32>
    %215 = arith.addf %214, %204 : vector<8x128xf32>
    %216 = arith.negf %215 : vector<8x128xf32>
    %217 = math.exp %216 : vector<8x128xf32>
    %cst_88 = arith.constant 1.000000e+00 : f32
    %218 = vector.broadcast %cst_88 : f32 to vector<8x128xf32>
    %219 = arith.addf %218, %217 : vector<8x128xf32>
    %220 = arith.divf %218, %219 : vector<8x128xf32>
    %221 = vector.extract_strided_slice %200 {offsets = [0, 256], sizes = [8, 128], strides = [1, 1]} : vector<8x384xf32> to vector<8x128xf32>
    %222 = vector.broadcast %6 : vector<1x128xf32> to vector<8x128xf32>
    %223 = arith.addf %206, %222 : vector<8x128xf32>
    %224 = arith.mulf %213, %223 : vector<8x128xf32>
    %225 = arith.addf %221, %224 : vector<8x128xf32>
    %226 = math.tanh %225 : vector<8x128xf32>
    %cst_89 = arith.constant 1.000000e+00 : f32
    %227 = vector.broadcast %cst_89 : f32 to vector<8x128xf32>
    %228 = arith.subf %227, %220 : vector<8x128xf32>
    %229 = arith.mulf %228, %226 : vector<8x128xf32>
    %230 = arith.mulf %220, %199 : vector<8x128xf32>
    %231 = arith.addf %229, %230 : vector<8x128xf32>
    %232 = vector.extract_strided_slice %5 {offsets = [56, 0], sizes = [8, 384], strides = [1, 1]} : vector<64x384xf32> to vector<8x384xf32>
    %c0_90 = arith.constant 0 : index
    %c0_91 = arith.constant 0 : index
    %233 = vector.load %arg2[%c0_90, %c0_91] : memref<128x384xf32, #tpu.memory_space<vmem>>, vector<128x128xf32>
    %cst_92 = arith.constant dense<0.000000e+00> : vector<8x128xf32>
    %234 = tpu.matmul %231, %233, %cst_92 {dimension_numbers = #tpu.dot_dimension_numbers<[1], [0], [0], [1], [0, 0, 1, 1], [], []>} : vector<8x128xf32>, vector<128x128xf32>, vector<8x128xf32> -> vector<8x128xf32>
    %c0_93 = arith.constant 0 : index
    %c128_94 = arith.constant 128 : index
    %235 = vector.load %arg2[%c0_93, %c128_94] : memref<128x384xf32, #tpu.memory_space<vmem>>, vector<128x128xf32>
    %cst_95 = arith.constant dense<0.000000e+00> : vector<8x128xf32>
    %236 = tpu.matmul %231, %235, %cst_95 {dimension_numbers = #tpu.dot_dimension_numbers<[1], [0], [0], [1], [0, 0, 1, 1], [], []>} : vector<8x128xf32>, vector<128x128xf32>, vector<8x128xf32> -> vector<8x128xf32>
    %c0_96 = arith.constant 0 : index
    %c256_97 = arith.constant 256 : index
    %237 = vector.load %arg2[%c0_96, %c256_97] : memref<128x384xf32, #tpu.memory_space<vmem>>, vector<128x128xf32>
    %cst_98 = arith.constant dense<0.000000e+00> : vector<8x128xf32>
    %238 = tpu.matmul %231, %237, %cst_98 {dimension_numbers = #tpu.dot_dimension_numbers<[1], [0], [0], [1], [0, 0, 1, 1], [], []>} : vector<8x128xf32>, vector<128x128xf32>, vector<8x128xf32> -> vector<8x128xf32>
    %239 = vector.extract_strided_slice %232 {offsets = [0, 0], sizes = [8, 128], strides = [1, 1]} : vector<8x384xf32> to vector<8x128xf32>
    %240 = arith.addf %239, %234 : vector<8x128xf32>
    %241 = arith.negf %240 : vector<8x128xf32>
    %242 = math.exp %241 : vector<8x128xf32>
    %cst_99 = arith.constant 1.000000e+00 : f32
    %243 = vector.broadcast %cst_99 : f32 to vector<8x128xf32>
    %244 = arith.addf %243, %242 : vector<8x128xf32>
    %245 = arith.divf %243, %244 : vector<8x128xf32>
    %246 = vector.extract_strided_slice %232 {offsets = [0, 128], sizes = [8, 128], strides = [1, 1]} : vector<8x384xf32> to vector<8x128xf32>
    %247 = arith.addf %246, %236 : vector<8x128xf32>
    %248 = arith.negf %247 : vector<8x128xf32>
    %249 = math.exp %248 : vector<8x128xf32>
    %cst_100 = arith.constant 1.000000e+00 : f32
    %250 = vector.broadcast %cst_100 : f32 to vector<8x128xf32>
    %251 = arith.addf %250, %249 : vector<8x128xf32>
    %252 = arith.divf %250, %251 : vector<8x128xf32>
    %253 = vector.extract_strided_slice %232 {offsets = [0, 256], sizes = [8, 128], strides = [1, 1]} : vector<8x384xf32> to vector<8x128xf32>
    %254 = vector.broadcast %6 : vector<1x128xf32> to vector<8x128xf32>
    %255 = arith.addf %238, %254 : vector<8x128xf32>
    %256 = arith.mulf %245, %255 : vector<8x128xf32>
    %257 = arith.addf %253, %256 : vector<8x128xf32>
    %258 = math.tanh %257 : vector<8x128xf32>
    %cst_101 = arith.constant 1.000000e+00 : f32
    %259 = vector.broadcast %cst_101 : f32 to vector<8x128xf32>
    %260 = arith.subf %259, %252 : vector<8x128xf32>
    %261 = arith.mulf %260, %258 : vector<8x128xf32>
    %262 = arith.mulf %252, %231 : vector<8x128xf32>
    %263 = arith.addf %261, %262 : vector<8x128xf32>
    %c0_102 = arith.constant 0 : index
    %c0_103 = arith.constant 0 : index
    %264 = vector.load %arg5[%c0_102, %c0_103] : memref<8x128xf32, #tpu.memory_space<vmem>>, vector<8x128xf32>
    tpu.vector_store %arg5[%c0_102, %c0_103], %263 {strides = array<i32>} : memref<8x128xf32, #tpu.memory_space<vmem>>, vector<8x128xf32>,
    return
  }
}

</mosaic_0001>

<bundles_post_ra>
// kernel: tpu_custom_call.1
= control target key start
LH: loop header
LB: loop body
LE: loop exit
PB: predicated region body
PF: predicated region fallthrough
CT: control target
= control target key end

     0   :  { %10 = vsyncpa [#allocation3], 0  ;;  %s5148_s0 = inlined_call_operand.hbm [shape: f32[64,128], index: 0, kind: input, shape index: {}]   ;;  %s5149_s1 = inlined_call_operand.hbm [shape: f32[128,384], index: 1, kind: input, shape index: {}]   ;;  %s5150_s2 = inlined_call_operand.hbm [shape: f32[128,384], index: 2, kind: input, shape index: {}]   ;;  %s5151_s3 = inlined_call_operand.vmem [shape: f32[1,384], index: 3, kind: input, shape index: {}]   ;;  %s5152_s4 = inlined_call_operand.vmem [shape: f32[1,128], index: 4, kind: input, shape index: {}]   ;;  %s5153_s5 = inlined_call_operand.hbm [shape: f32[8,128], index: 5, kind: output, shape index: {}]  }
   0x1   :  { %11 = vsyncpa [#allocation6], 0 }
   0x2   :  { %12 = vsyncpa [#allocation4], 0  ;;  %s4432_s18 = smov [#allocation5]   ;;  %s4338_s22 = scalar_lea.hbm %s5149_s1, 6144 }
   0x3   :  { %s30_s19 = sshll.u32 %s4432_s18, 4  ;;  %p4339_p0 = scmp.ne.s32.totalorder %s5149_s1, %s4338_s22  ;;  %s31_s19 = int_to_ptr.vmem [resolvable:$true] %s30_s19 }
   0x4   :  { %p4342_p1 = scmp.lt.u32.totalorder %s4338_s22, %s5149_s1 }
   0x6   :  { %p4344_p2 = pnand %p4342_p1, %p4339_p0 }
   0x8   :  { %4347 = shalt.err (!%p4344_p2)
}
   0x9   :  { %s4348_s27 = scalar_lea.vmem %s31_s19, 6144  ;;  %p4353_p4 = scmp.lt.s32.totalorder %s31_s19, %s31_s19 }
   0xa   :  { %p4349_p3 = scmp.ne.s32.totalorder %s31_s19, %s4348_s27  ;;  %p4354_p5 = scmp.lt.s32.totalorder %s4348_s27, %s4348_s27 }
   0xc   :  { %p4355_p6 = por %p4354_p5, %p4353_p4 }
   0xe   :  { %p4356_p7 = pnand %p4355_p6, %p4349_p3 }
  0x10   :  { %4359 = shalt.err (!%p4356_p7)
}
  0x11   :  { %s4433_s28 = smov 384   ;;  %s4434_s29 = smov 24  }
  0x12   :  { %36 = dma.hbm_to_vmem [thread:$0]  %s5149_s1, 6144, %s31_s19, [#allocation6], %s4433_s28, %s4433_s28, %s4434_s29  }
  0x13   :  { %s4435_s7 = smov [#allocation2]   ;;  %s4360_s11 = scalar_lea.hbm %s5148_s0, 1024 }
  0x14   :  { %s18_s8 = sshll.u32 %s4435_s7, 4  ;;  %p4361_p8 = scmp.ne.s32.totalorder %s5148_s0, %s4360_s11  ;;  %s19_s8 = int_to_ptr.vmem [resolvable:$true] %s18_s8 }
  0x15   :  { %p4364_p9 = scmp.lt.u32.totalorder %s4360_s11, %s5148_s0 }
  0x17   :  { %p4366_p10 = pnand %p4364_p9, %p4361_p8 }
  0x19   :  { %4369 = shalt.err (!%p4366_p10)
}
  0x1a   :  { %s4370_s16 = scalar_lea.vmem %s19_s8, 1024  ;;  %p4375_p12 = scmp.lt.s32.totalorder %s19_s8, %s19_s8 }
  0x1b   :  { %p4371_p11 = scmp.ne.s32.totalorder %s19_s8, %s4370_s16  ;;  %p4376_p13 = scmp.lt.s32.totalorder %s4370_s16, %s4370_s16 }
  0x1d   :  { %p4377_p0 = por %p4376_p13, %p4375_p12 }
  0x1f   :  { %p4378_p1 = pnand %p4377_p0, %p4371_p11 }
  0x21   :  { %4381 = shalt.err (!%p4378_p1)
}
  0x22   :  { %s4436_s1 = smov 128   ;;  %s4437_s17 = smov 8  }
  0x23   :  { %24 = dma.hbm_to_vmem [thread:$0]  %s5148_s0, 1024, %s19_s8, [#allocation3], %s4436_s1, %s4436_s1, %s4437_s17  }
  0x24   :  { %s4438_s20 = smov [#allocation7]   ;;  %s4382_s24 = scalar_lea.hbm %s5150_s2, 6144 }
  0x25   :  { %s42_s21 = sshll.u32 %s4438_s20, 4  ;;  %p4383_p2 = scmp.ne.s32.totalorder %s5150_s2, %s4382_s24  ;;  %s43_s21 = int_to_ptr.vmem [resolvable:$true] %s42_s21 }
  0x26   :  { %p4386_p3 = scmp.lt.u32.totalorder %s4382_s24, %s5150_s2 }
  0x28   :  { %p4388_p4 = pnand %p4386_p3, %p4383_p2 }
  0x2a   :  { %4391 = shalt.err (!%p4388_p4)
}
  0x2b   :  { %s4392_s6 = scalar_lea.vmem %s43_s21, 6144  ;;  %p4397_p6 = scmp.lt.s32.totalorder %s43_s21, %s43_s21 }
  0x2c   :  { %p4393_p5 = scmp.ne.s32.totalorder %s43_s21, %s4392_s6  ;;  %p4398_p7 = scmp.lt.s32.totalorder %s4392_s6, %s4392_s6 }
  0x2e   :  { %p4399_p8 = por %p4398_p7, %p4397_p6 }
  0x30   :  { %p4400_p9 = pnand %p4399_p8, %p4393_p5 }
  0x32   :  { %4403 = shalt.err (!%p4400_p9)
}
  0x33   :  { %48 = dma.hbm_to_vmem [thread:$0]  %s5150_s2, 6144, %s43_s21, [#allocation6], %s4433_s28, %s4433_s28, %s4434_s29  }
  0x34   :  { %4426 = dma.done.wait [#allocation3], 1024  }
  0x35   :  { %4427 = vsyncadd [#allocation3], 4294966272 }
  0x36   :  { %4428 = dma.done.wait [#allocation6], 12288  }
  0x37   :  { %4429 = vsyncadd [#allocation6], 4294955008  ;;  %v5156_v0 = vmov 0.0   ;;  %v71_v1 = vld [vmem:[#allocation5 + $0x8] sm:$0xff]  ;;  %v74_v2 = vld [vmem:[#allocation5 + $0x20] sm:$0xff]  ;;  %vm4441_vm0 = vmmov 0  }
  0x38   :  { %199 = vmatprep.mubr.f32.mxu0 %v5156_v0  ;;  %v72_v3 = vld [vmem:[#allocation5 + $0x10] sm:$0xff]  ;;  %v3606_v4 = vpack.c.bf16 %v74_v2, %v71_v1  ;;  %v75_v5 = vld [vmem:[#allocation5 + $0x28] sm:$0xff]  ;;  %v70_v6 = vld [vmem:[#allocation5] sm:$0xff]  ;;  %s4442_s10 = smov [#allocation8]  }
  0x39   :  { %v73_v7 = vld [vmem:[#allocation5 + $0x18] sm:$0xff]  ;;  %v3638_v8 = vpack.c.bf16 %v75_v5, %v72_v3  ;;  %v80_v11 = vld [vmem:[#allocation5 + $0x50] sm:$0xff]  ;;  %v78_v12 = vld [vmem:[#allocation5 + $0x40] sm:$0xff]  ;;  %s2263_s11 = sshll.u32 %s4442_s10, 4  ;;  %s2264_s11 = int_to_ptr.vmem [resolvable:$true] %s2263_s11 }
  0x3a   :  { %v3608_v9 = vpack.c.bf16 %v73_v7, %v70_v6  ;;  %v77_v10 = vld [vmem:[#allocation5 + $0x38] sm:$0xff]  ;;  %3607 = vmatprep.subr.bf16.mxu0 %v3606_v4  ;;  %v76_v15 = vld [vmem:[#allocation5 + $0x30] sm:$0xff]  ;;  %v79_v16 = vld [vmem:[#allocation5 + $0x48] sm:$0xff]  ;;  %s4404_s12 = scalar_lea.vmem %s2264_s11, 128  ;;  %p4409_p11 = scmp.lt.s32.totalorder %s2264_s11, %s2264_s11 }
  0x3b   :  { %v3610_v13 = vpack.c.bf16 %v80_v11, %v77_v10  ;;  %v81_v14 = vld [vmem:[#allocation5 + $0x58] sm:$0xff]  ;;  %3639 = vmatprep.subr.bf16.mxu1 %v3638_v8  ;;  %v3612_v18 = vpack.c.bf16 %v79_v16, %v76_v15  ;;  %v83_v19 = vld [vmem:[#allocation5 + $0x68] sm:$0xff]  ;;  %v86_v20 = vld [vmem:[#allocation5 + $0x80] sm:$0xff]  ;;  %v5154_v16 = vmov 0.0|0.0   ;;  %p4405_p10 = scmp.ne.s32.totalorder %s2264_s11, %s4404_s12  ;;  %p4410_p12 = scmp.lt.s32.totalorder %s4404_s12, %s4404_s12 }
  0x3c   :  { %3609 = vmatpush1.bf16.msra.mxu0 %v3608_v9  ;;  %v3642_v17 = vpack.c.bf16 %v81_v14, %v78_v12  ;;  %v84_v21 = vld [vmem:[#allocation5 + $0x70] sm:$0xff]  ;;  %3641 = vmatpush3.bf16.msra.mxu1 %v3638_v8  ;;  %v3614_v22 = vpack.c.bf16 %v86_v20, %v83_v19  ;;  %v87_v23 = vld [vmem:[#allocation5 + $0x88] sm:$0xff]  ;;  %v82_v24 = vld [vmem:[#allocation5 + $0x60] sm:$0xff] }
  0x3d   :  { %3611 = vmatprep.subr.bf16.mxu0 %v3610_v13  ;;  %v85_v25 = vld [vmem:[#allocation5 + $0x78] sm:$0xff]  ;;  %v3646_v26 = vpack.c.bf16 %v87_v23, %v84_v21  ;;  %v92_v28 = vld [vmem:[#allocation5 + $0xb0] sm:$0xff]  ;;  %v90_v29 = vld [vmem:[#allocation5 + $0xa0] sm:$0xff]  ;;  %p4411_p13 = por %p4410_p12, %p4409_p11 }
  0x3e   :  { %3643 = vmatprep.subr.bf16.mxu1 %v3642_v17  ;;  %v89_v27 = vld [vmem:[#allocation5 + $0x98] sm:$0xff]  ;;  %v3616_v31 = vpack.c.bf16 %v85_v25, %v82_v24  ;;  %v88_v33 = vld [vmem:[#allocation5 + $0x90] sm:$0xff]  ;;  %v91_v34 = vld [vmem:[#allocation5 + $0xa8] sm:$0xff] }
  0x3f   :  { %v93_v30 = vld [vmem:[#allocation5 + $0xb8] sm:$0xff]  ;;  %v3618_v32 = vpack.c.bf16 %v92_v28, %v89_v27  ;;  %v95_v36 = vld [vmem:[#allocation5 + $0xc8] sm:$0xff]  ;;  %v98_v37 = vld [vmem:[#allocation5 + $0xe0] sm:$0xff]  ;;  %v3620_v40 = vpack.c.bf16 %v91_v34, %v88_v33  ;;  %p4412_p0 = pnand %p4411_p13, %p4405_p10 }
  0x40   :  { %3613 = vmatpush1.bf16.msra.mxu0 %v3612_v18  ;;  %3645 = vmatpush3.bf16.msra.mxu1 %v3642_v17  ;;  %v3650_v35 = vpack.c.bf16 %v93_v30, %v90_v29  ;;  %v96_v38 = vld [vmem:[#allocation5 + $0xd0] sm:$0xff]  ;;  %v99_v39 = vld [vmem:[#allocation5 + $0xe8] sm:$0xff]  ;;  %v3622_v41 = vpack.c.bf16 %v98_v37, %v95_v36  ;;  %v94_v42 = vld [vmem:[#allocation5 + $0xc0] sm:$0xff] }
  0x41   :  { %3615 = vmatprep.subr.bf16.mxu0 %v3614_v22  ;;  %3647 = vmatprep.subr.bf16.mxu1 %v3646_v26  ;;  %v97_v43 = vld [vmem:[#allocation5 + $0xd8] sm:$0xff]  ;;  %v3654_v44 = vpack.c.bf16 %v99_v39, %v96_v38  ;;  %v104_v46 = vld [vmem:[#allocation5 + $0x110] sm:$0xff]  ;;  %v102_v47 = vld [vmem:[#allocation5 + $0x100] sm:$0xff] }
  0x42   :  { %v101_v45 = vld [vmem:[#allocation5 + $0xf8] sm:$0xff]  ;;  %v3624_v49 = vpack.c.bf16 %v97_v43, %v94_v42  ;;  %v62_v50 = vld [vmem:[#allocation2] sm:$0xff]  ;;  %v100_v52 = vld [vmem:[#allocation5 + $0xf0] sm:$0xff] }
  0x43   :  { %v105_v48 = vld [vmem:[#allocation5 + $0x118] sm:$0xff]  ;;  %v3626_v51 = vpack.c.bf16 %v104_v46, %v101_v45  ;;  %v103_v53 = vld [vmem:[#allocation5 + $0x108] sm:$0xff]  ;;  %v110_v56 = vld [vmem:[#allocation5 + $0x140] sm:$0xff]  ;;  %2754 = vmatprep.mubr.f32.mxu1 %v62_v50 }
  0x44   :  { %3617 = vmatpush1.bf16.msra.mxu0 %v3616_v31  ;;  %3649 = vmatpush3.bf16.msra.mxu1 %v3646_v26  ;;  %v3658_v54 = vpack.c.bf16 %v105_v48, %v102_v47  ;;  %v107_v55 = vld [vmem:[#allocation5 + $0x128] sm:$0xff]  ;;  %v108_v57 = vld [vmem:[#allocation5 + $0x130] sm:$0xff]  ;;  %v3628_v59 = vpack.c.bf16 %v103_v53, %v100_v52  ;;  %v106_v61 = vld [vmem:[#allocation5 + $0x120] sm:$0xff] }
  0x45   :  { %3619 = vmatprep.subr.bf16.mxu0 %v3618_v32  ;;  %3651 = vmatprep.subr.bf16.mxu1 %v3650_v35  ;;  %v111_v58 = vld [vmem:[#allocation5 + $0x148] sm:$0xff]  ;;  %v3630_v60 = vpack.c.bf16 %v110_v56, %v107_v55  ;;  %v109_v62 = vld [vmem:[#allocation5 + $0x138] sm:$0xff]  ;;  %v116_v2 = vld [vmem:[#allocation5 + $0x170] sm:$0xff] }
  0x46   :  { %v3662_v63 = vpack.c.bf16 %v111_v58, %v108_v57  ;;  %v113_v1 = vld [vmem:[#allocation5 + $0x158] sm:$0xff]  ;;  %v114_v3 = vld [vmem:[#allocation5 + $0x160] sm:$0xff]  ;;  %v3632_v5 = vpack.c.bf16 %v109_v62, %v106_v61  ;;  %v112_v7 = vld [vmem:[#allocation5 + $0x150] sm:$0xff] }
  0x47   :  { %v117_v4 = vld [vmem:[#allocation5 + $0x178] sm:$0xff]  ;;  %v3634_v6 = vpack.c.bf16 %v116_v2, %v113_v1  ;;  %v115_v8 = vld [vmem:[#allocation5 + $0x168] sm:$0xff]  ;;  %v354_v11 = vld [vmem:[#allocation7] sm:$0xff] }
  0x48   :  { %3621 = vmatpush1.bf16.msra.mxu0 %v3620_v40  ;;  %3653 = vmatpush3.bf16.msra.mxu1 %v3650_v35  ;;  %v3666_v9 = vpack.c.bf16 %v117_v4, %v114_v3  ;;  %v3636_v10 = vpack.c.bf16 %v115_v8, %v112_v7  ;;  %v355_v12 = vld [vmem:[#allocation7 + $0x18] sm:$0xff]  ;;  %v440_v13 = vld [vmem:[#allocation7 + $0x8] sm:$0xff]  ;;  %v441_v14 = vld [vmem:[#allocation7 + $0x20] sm:$0xff] }
  0x49   :  { %3623 = vmatprep.subr.bf16.mxu0 %v3622_v41  ;;  %3655 = vmatprep.subr.bf16.mxu1 %v3654_v44  ;;  %v4516_v15 = vpack.c.bf16 %v355_v12, %v354_v11  ;;  %v63_v17 = vld [vmem:[#allocation2 + $0x8] sm:$0xff]  ;;  %v4519_v18 = vpack.c.bf16 %v441_v14, %v440_v13  ;;  %v356_v19 = vld [vmem:[#allocation7 + $0x30] sm:$0xff]  ;;  %v442_v21 = vld [vmem:[#allocation7 + $0x38] sm:$0xff] }
  0x4a   :  { %v357_v20 = vld [vmem:[#allocation7 + $0x48] sm:$0xff]  ;;  %v443_v22 = vld [vmem:[#allocation7 + $0x50] sm:$0xff]  ;;  %v358_v25 = vld [vmem:[#allocation7 + $0x60] sm:$0xff] }
  0x4b   :  { %v4523_v23 = vpack.c.bf16 %v357_v20, %v356_v19  ;;  %v4527_v24 = vpack.c.bf16 %v443_v22, %v442_v21  ;;  %v359_v26 = vld [vmem:[#allocation7 + $0x78] sm:$0xff]  ;;  %v64_v27 = vld [vmem:[#allocation2 + $0x10] sm:$0xff]  ;;  %v444_v28 = vld [vmem:[#allocation7 + $0x68] sm:$0xff] }
  0x4c   :  { %3625 = vmatpush1.bf16.msra.mxu0 %v3624_v49  ;;  %3657 = vmatpush3.bf16.msra.mxu1 %v3654_v44  ;;  %v445_v29 = vld [vmem:[#allocation7 + $0x80] sm:$0xff]  ;;  %v4533_v30 = vpack.c.bf16 %v359_v26, %v358_v25  ;;  %v65_v32 = vld [vmem:[#allocation2 + $0x18] sm:$0xff]  ;;  %v360_v33 = vld [vmem:[#allocation7 + $0x90] sm:$0xff] }
  0x4d   :  { %3627 = vmatprep.subr.bf16.mxu0 %v3626_v51  ;;  %3659 = vmatprep.subr.bf16.mxu1 %v3658_v54  ;;  %v4537_v31 = vpack.c.bf16 %v445_v29, %v444_v28  ;;  %v361_v34 = vld [vmem:[#allocation7 + $0xa8] sm:$0xff]  ;;  %v446_v35 = vld [vmem:[#allocation7 + $0x98] sm:$0xff]  ;;  %v447_v36 = vld [vmem:[#allocation7 + $0xb0] sm:$0xff] }
  0x4e   :  { %v66_v37 = vld [vmem:[#allocation2 + $0x20] sm:$0xff]  ;;  %v4542_v38 = vpack.c.bf16 %v361_v34, %v360_v33  ;;  %v4546_v39 = vpack.c.bf16 %v447_v36, %v446_v35  ;;  %v363_v41 = vld [vmem:[#allocation7 + $0xd8] sm:$0xff]  ;;  %v67_v42 = vld [vmem:[#allocation2 + $0x28] sm:$0xff]  ;;  %v120_v35 = vlaneseq }
  0x4f   :  { %v362_v40 = vld [vmem:[#allocation7 + $0xc0] sm:$0xff]  ;;  %v448_v43 = vld [vmem:[#allocation7 + $0xc8] sm:$0xff]  ;;  %v68_v45 = vld [vmem:[#allocation2 + $0x30] sm:$0xff] }
  0x50   :  { %3629 = vmatpush1.bf16.msra.mxu0 %v3628_v59  ;;  %3661 = vmatpush3.bf16.msra.mxu1 %v3658_v54  ;;  %v449_v44 = vld [vmem:[#allocation7 + $0xe0] sm:$0xff]  ;;  %v69_v46 = vld [vmem:[#allocation2 + $0x38] sm:$0xff]  ;;  %v4551_v47 = vpack.c.bf16 %v363_v41, %v362_v40  ;;  %v364_v49 = vld [vmem:[#allocation7 + $0xf0] sm:$0xff]  ;;  %v121_v36 = vshrl.u32 %v120_v35, 7 }
  0x51   :  { %3631 = vmatprep.subr.bf16.mxu0 %v3630_v60  ;;  %3663 = vmatprep.subr.bf16.mxu1 %v3662_v63  ;;  %v4555_v48 = vpack.c.bf16 %v449_v44, %v448_v43  ;;  %v450_v51 = vld [vmem:[#allocation7 + $0xf8] sm:$0xff]  ;;  %v451_v52 = vld [vmem:[#allocation7 + $0x110] sm:$0xff]  ;;  %v366_v55 = vld [vmem:[#allocation7 + $0x120] sm:$0xff] }
  0x52   :  { %v4566_v54 = vpack.c.bf16 %v451_v52, %v450_v51  ;;  %v367_v56 = vld [vmem:[#allocation7 + $0x138] sm:$0xff]  ;;  %v452_v57 = vld [vmem:[#allocation7 + $0x128] sm:$0xff]  ;;  %v453_v58 = vld [vmem:[#allocation7 + $0x140] sm:$0xff]  ;;  %v126_v44 = vsub.s32 1, %v121_v36 }
  0x53   :  { %v4571_v59 = vpack.c.bf16 %v367_v56, %v366_v55  ;;  %v4575_v60 = vpack.c.bf16 %v453_v58, %v452_v57  ;;  %v368_v61 = vld [vmem:[#allocation7 + $0x150] sm:$0xff]  ;;  %v369_v62 = vld [vmem:[#allocation7 + $0x168] sm:$0xff]  ;;  %v528_v7 = vld [vmem:[#allocation7 + $0x40] sm:$0xff] }
  0x54   :  { %3633 = vmatpush1.bf16.msra.mxu0 %v3632_v5  ;;  %3665 = vmatpush3.bf16.msra.mxu1 %v3662_v63  ;;  %v454_v63 = vld [vmem:[#allocation7 + $0x158] sm:$0xff]  ;;  %v455_v1 = vld [vmem:[#allocation7 + $0x170] sm:$0xff]  ;;  %v4580_v2 = vpack.c.bf16 %v369_v62, %v368_v61  ;;  %v527_v5 = vld [vmem:[#allocation7 + $0x28] sm:$0xff] }
  0x55   :  { %3635 = vmatprep.subr.bf16.mxu0 %v3634_v6  ;;  %3667 = vmatprep.subr.bf16.mxu1 %v3666_v9  ;;  %v4584_v3 = vpack.c.bf16 %v455_v1, %v454_v63  ;;  %v526_v4 = vld [vmem:[#allocation7 + $0x10] sm:$0xff]  ;;  %v529_v8 = vld [vmem:[#allocation7 + $0x58] sm:$0xff]  ;;  %v531_v11 = vld [vmem:[#allocation7 + $0x88] sm:$0xff] }
  0x56   :  { %v4590_v6 = vpack.c.bf16 %v527_v5, %v526_v4  ;;  %v532_v13 = vld [vmem:[#allocation7 + $0xa0] sm:$0xff]  ;;  %v533_v14 = vld [vmem:[#allocation7 + $0xb8] sm:$0xff]  ;;  %v534_v19 = vld [vmem:[#allocation7 + $0xd0] sm:$0xff] }
  0x57   :  { %v535_v20 = vld [vmem:[#allocation7 + $0xe8] sm:$0xff]  ;;  %v536_v22 = vld [vmem:[#allocation7 + $0x100] sm:$0xff]  ;;  %v537_v25 = vld [vmem:[#allocation7 + $0x118] sm:$0xff] }
  0x58   :  { %3637 = vmatpush1.bf16.msra.mxu0 %v3636_v10  ;;  %3669 = vmatpush3.bf16.msra.mxu1 %v3666_v9  ;;  %v4598_v9 = vpack.c.bf16 %v529_v8, %v528_v7  ;;  %v530_v10 = vld [vmem:[#allocation7 + $0x70] sm:$0xff]  ;;  %v4620_v21 = vpack.c.bf16 %v535_v20, %v534_v19  ;;  %v4626_v26 = vpack.c.bf16 %v537_v25, %v536_v22  ;;  %v539_v28 = vld [vmem:[#allocation7 + $0x148] sm:$0xff]  ;;  %v541_v33 = vld [vmem:[#allocation7 + $0x178] sm:$0xff] }
  0x59   :  { %3670 = vmatprep.subr.bf16.mxu0 %v5154_v16  ;;  %3694 = vmatprep.subr.bf16.mxu1 %v5154_v16  ;;  %v4608_v12 = vpack.c.bf16 %v531_v11, %v530_v10  ;;  %v118_v40 = vld [vmem:[%s5151_s3] sm:$0x7] }
  0x5a   :  { %v127_v52 = vrot.slane %v118_v40, %v126_v44 }
  0x5b   :  { %200 = vmatmul.mubr.f32.vlgmr.msra.gmra.mrb[0].mxu0 %v62_v50  ;;  %2755 = vmatmul.mubr.f32.vlgmr.msra.gmra.mrb[0].mxu1 %v63_v17  ;;  %v365_v50 = vld [vmem:[#allocation7 + $0x108] sm:$0xff] }
  0x5c   :  { %3672 = vmatpush3.bf16.msra.mxu0 %v4516_v15  ;;  %3696 = vmatpush3.bf16.msra.mxu1 %v4519_v18  ;;  %v4562_v53 = vpack.c.bf16 %v365_v50, %v364_v49 }
  0x5d   :  { %205 = vmatprep.mubr.f32.mxu0 %v5156_v0  ;;  %3673 = vmatprep.subr.bf16.mxu0 %v5154_v16 }
  0x5e   :  { %3697 = vmatprep.subr.bf16.mxu1 %v5154_v16  ;;  %2757 = vmatprep.mubr.f32.mxu1 %v64_v27 }
  0x5f   :  { %206 = vmatmul.mubr.f32.gmra.mrb[2].mxu0 %v63_v17  ;;  %2758 = vmatmul.mubr.f32.gmra.mrb[2].mxu1 %v65_v32  ;;  %v4614_v17 = vpack.c.bf16 %v533_v14, %v532_v13 }
  0x60   :  { %3675 = vmatpush3.bf16.msra.mxu0 %v4523_v23  ;;  %211 = vmatprep.mubr.f32.mxu0 %v5156_v0 }
  0x61   :  { %3699 = vmatpush3.bf16.msra.mxu1 %v4527_v24  ;;  %3676 = vmatprep.subr.bf16.mxu0 %v5154_v16 }
  0x62   :  { %3700 = vmatprep.subr.bf16.mxu1 %v5154_v16  ;;  %2760 = vmatprep.mubr.f32.mxu1 %v66_v37 }
  0x63   :  { %212 = vmatmul.mubr.f32.gmra.mrb[4].mxu0 %v64_v27  ;;  %2761 = vmatmul.mubr.f32.gmra.mrb[4].mxu1 %v67_v42  ;;  %v538_v27 = vld [vmem:[#allocation7 + $0x130] sm:$0xff] }
  0x64   :  { %3678 = vmatpush3.bf16.msra.mxu0 %v4533_v30  ;;  %217 = vmatprep.mubr.f32.mxu0 %v5156_v0  ;;  %v4632_v29 = vpack.c.bf16 %v539_v28, %v538_v27 }
  0x65   :  { %3702 = vmatpush3.bf16.msra.mxu1 %v4537_v31  ;;  %3679 = vmatprep.subr.bf16.mxu0 %v5154_v16 }
  0x66   :  { %3703 = vmatprep.subr.bf16.mxu1 %v5154_v16  ;;  %2763 = vmatprep.mubr.f32.mxu1 %v68_v45 }
  0x67   :  { %218 = vmatmul.mubr.f32.gmra.mrb[6].mxu0 %v65_v32  ;;  %2764 = vmatmul.mubr.f32.gmra.mrb[6].mxu1 %v69_v46  ;;  %v540_v32 = vld [vmem:[#allocation7 + $0x160] sm:$0xff] }
  0x68   :  { %3681 = vmatpush3.bf16.msra.mxu0 %v4542_v38  ;;  %223 = vmatprep.mubr.f32.mxu0 %v5156_v0  ;;  %v4638_v34 = vpack.c.bf16 %v541_v33, %v540_v32 }
  0x69   :  { %3705 = vmatpush3.bf16.msra.mxu1 %v4546_v39  ;;  %3682 = vmatprep.subr.bf16.mxu0 %v5154_v16 }
  0x6a   :  { %3706 = vmatprep.subr.bf16.mxu1 %v5154_v16  ;;  %2833 = vmatprep.mubr.msk.f32.mxu1 %vm4441_vm0, %v5156_v0 }
  0x6b   :  { %224 = vmatmul.mubr.f32.gmra.mrb[8].mxu0 %v66_v37  ;;  %v130_v37 = vsub.s32 2, %v121_v36 }
  0x6c   :  { %3684 = vmatpush3.bf16.msra.mxu0 %v4551_v47  ;;  %229 = vmatprep.mubr.f32.mxu0 %v5156_v0 }
  0x6d   :  { %3708 = vmatpush3.bf16.msra.mxu1 %v4555_v48  ;;  %3685 = vmatprep.subr.bf16.mxu0 %v5154_v16  ;;  %v4669_v41 = vrot.slane %v118_v40, %v130_v37 }
  0x6e   :  { %3709 = vmatprep.subr.bf16.mxu1 %v5154_v16 }
  0x6f   :  { %230 = vmatmul.mubr.f32.gmra.mrb[10].mxu0 %v67_v42  ;;  %v122_v42 = vsub.s32 0, %v121_v36 }
  0x70   :  { %3687 = vmatpush3.bf16.msra.mxu0 %v4562_v53  ;;  %235 = vmatprep.mubr.f32.mxu0 %v5156_v0 }
  0x71   :  { %3711 = vmatpush3.bf16.msra.mxu1 %v4566_v54  ;;  %3688 = vmatprep.subr.bf16.mxu0 %v5154_v16  ;;  %v123_v51 = vrot.slane %v118_v40, %v122_v42 }
  0x72   :  { %3712 = vmatprep.subr.bf16.mxu1 %v5154_v16 }
  0x73   :  { %236 = vmatmul.mubr.f32.gmra.mrb[12].mxu0 %v68_v45 }
  0x74   :  { %3690 = vmatpush3.bf16.msra.mxu0 %v4571_v59  ;;  %241 = vmatprep.mubr.f32.mxu0 %v5156_v0 }
  0x75   :  { %3714 = vmatpush3.bf16.msra.mxu1 %v4575_v60  ;;  %3691 = vmatprep.subr.bf16.mxu0 %v5154_v16 }
  0x76   :  { %3715 = vmatprep.subr.bf16.mxu1 %v5154_v16 }
  0x77   :  { %242 = vmatmul.mubr.f32.gmra.mrb[14].mxu0 %v69_v46 }
  0x78   :  { %3693 = vmatpush3.bf16.msra.mxu0 %v4580_v2  ;;  %2798 = vmatprep.mubr.msk.f32.mxu0 %vm4441_vm0, %v5156_v0 }
  0x79   :  { %3717 = vmatpush3.bf16.msra.mxu1 %v4584_v3  ;;  %3718 = vmatprep.subr.bf16.mxu0 %v5154_v16 }
  0x7a   :  { %3742 = vmatprep.subr.bf16.mxu1 %v5154_v16 }
  0x7b   :  { %2799 = vmatmul.mubr.f32.vlgmr.msra.gmra.mrb[16].mxu0 %v5156_v0 }
  0x7c   :  { %2834 = vmatmul.mubr.f32.vlgmr.msra.gmra.mrb[8].mxu1 %v5156_v0  ;;  %3720 = vmatpush3.bf16.msra.mxu0 %v4590_v6 }
  0x7d   :  { %3721 = vmatprep.subr.bf16.mxu0 %v5154_v16  ;;  %2868 = vmatprep.mubr.msk.f32.mxu0 %vm4441_vm0, %v5156_v0 }
  0x7e   :  { %3744 = vmatpush3.bf16.msra.mxu1 %v4516_v15  ;;  %2903 = vmatprep.mubr.msk.f32.mxu1 %vm4441_vm0, %v5156_v0 }
  0x7f   :  { %3745 = vmatprep.subr.bf16.mxu1 %v5154_v16 }
  0x80   :  { %3723 = vmatpush3.bf16.msra.mxu0 %v4598_v9 }
  0x81   :  { %3724 = vmatprep.subr.bf16.mxu0 %v5154_v16 }
  0x82   :  { %3747 = vmatpush3.bf16.msra.mxu1 %v4523_v23 }
  0x83   :  { %3748 = vmatprep.subr.bf16.mxu1 %v5154_v16 }
  0x84   :  { %3726 = vmatpush3.bf16.msra.mxu0 %v4608_v12 }
  0x85   :  { %3727 = vmatprep.subr.bf16.mxu0 %v5154_v16 }
  0x86   :  { %3750 = vmatpush3.bf16.msra.mxu1 %v4533_v30 }
  0x87   :  { %3751 = vmatprep.subr.bf16.mxu1 %v5154_v16 }
  0x88   :  { %3729 = vmatpush3.bf16.msra.mxu0 %v4614_v17 }
  0x89   :  { %3730 = vmatprep.subr.bf16.mxu0 %v5154_v16 }
  0x8a   :  { %3753 = vmatpush3.bf16.msra.mxu1 %v4542_v38 }
  0x8b   :  { %3754 = vmatprep.subr.bf16.mxu1 %v5154_v16 }
  0x8c   :  { %3732 = vmatpush3.bf16.msra.mxu0 %v4620_v21 }
  0x8d   :  { %3733 = vmatprep.subr.bf16.mxu0 %v5154_v16 }
  0x8e   :  { %3756 = vmatpush3.bf16.msra.mxu1 %v4551_v47 }
  0x8f   :  { %3757 = vmatprep.subr.bf16.mxu1 %v5154_v16 }
  0x90   :  { %3735 = vmatpush3.bf16.msra.mxu0 %v4626_v26 }
  0x91   :  { %3736 = vmatprep.subr.bf16.mxu0 %v5154_v16 }
  0x92   :  { %3759 = vmatpush3.bf16.msra.mxu1 %v4562_v53 }
  0x93   :  { %3760 = vmatprep.subr.bf16.mxu1 %v5154_v16 }
  0x94   :  { %3738 = vmatpush3.bf16.msra.mxu0 %v4632_v29 }
  0x95   :  { %3739 = vmatprep.subr.bf16.mxu0 %v5154_v16 }
  0x96   :  { %3762 = vmatpush3.bf16.msra.mxu1 %v4571_v59 }
  0x97   :  { %3763 = vmatprep.subr.bf16.mxu1 %v5154_v16 }
  0x98   :  { %3741 = vmatpush3.bf16.msra.mxu0 %v4638_v34 }
  0x99   :  { %3766 = vmatprep.subr.bf16.mxu0 %v5154_v16 }
  0x9a   :  { %3765 = vmatpush3.bf16.msra.mxu1 %v4580_v2 }
  0x9b   :  { %2869 = vmatmul.mubr.f32.vlgmr.msra.gmra.mrb[18].mxu0 %v5156_v0  ;;  %3790 = vmatprep.subr.bf16.mxu1 %v5154_v16 }
  0x9c   :  { %3768 = vmatpush3.bf16.msra.mxu0 %v4519_v18  ;;  %2938 = vmatprep.mubr.msk.f32.mxu0 %vm4441_vm0, %v5156_v0 }
  0x9d   :  { %3769 = vmatprep.subr.bf16.mxu0 %v5154_v16 }
  0xa0   :  { %3771 = vmatpush3.bf16.msra.mxu0 %v4527_v24 }
  0xa1   :  { %3772 = vmatprep.subr.bf16.mxu0 %v5154_v16 }
  0xa4   :  { %3774 = vmatpush3.bf16.msra.mxu0 %v4537_v31 }
  0xa5   :  { %3775 = vmatprep.subr.bf16.mxu0 %v5154_v16 }
  0xa8   :  { %3777 = vmatpush3.bf16.msra.mxu0 %v4546_v39 }
  0xa9   :  { %3778 = vmatprep.subr.bf16.mxu0 %v5154_v16 }
  0xac   :  { %3780 = vmatpush3.bf16.msra.mxu0 %v4555_v48 }
  0xad   :  { %3781 = vmatprep.subr.bf16.mxu0 %v5154_v16 }
  0xb0   :  { %3783 = vmatpush3.bf16.msra.mxu0 %v4566_v54 }
  0xb1   :  { %3784 = vmatprep.subr.bf16.mxu0 %v5154_v16 }
  0xb4   :  { %3786 = vmatpush3.bf16.msra.mxu0 %v4575_v60 }
  0xb5   :  { %3787 = vmatprep.subr.bf16.mxu0 %v5154_v16 }
  0xb8   :  { %3789 = vmatpush3.bf16.msra.mxu0 %v4584_v3 }
  0xb9   :  { %3814 = vmatprep.subr.bf16.mxu0 %v5154_v16 }
 0x12e   :  { %v201_v43 = vpop.f32.mrb[0].mxu0  ;;  %v2756_v46 = vpop.f32.mrb[0].mxu1 }
 0x12f   :  { %v203_v45 = vpop.f32.mrb[1].mxu0  ;;  %v4672_v49 = vadd.f32 %v2756_v46, %v4669_v41  ;;  %v4674_v50 = vpop.f32.mrb[1].mxu1 }
 0x132   :  { %v207_v55 = vpop.f32.mrb[2].mxu0  ;;  %v2759_v61 = vpop.f32.mrb[2].mxu1 }
 0x133   :  { %v4676_v56 = vadd.f32 %v207_v55, %v123_v51  ;;  %v209_v57 = vpop.f32.mrb[3].mxu0  ;;  %v4681_v63 = vadd.f32 %v2759_v61, %v4669_v41  ;;  %v324_v1 = vpop.f32.mrb[3].mxu1 }
 0x134   :  { %v4678_v58 = vadd.f32 %v209_v57, %v127_v52  ;;  %v4686_v7 = vadd.f32 %v324_v1, %v4669_v41 }
 0x136   :  { %v213_v62 = vpop.f32.mrb[4].mxu0  ;;  %v2762_v10 = vpop.f32.mrb[4].mxu1 }
 0x137   :  { %v4683_v4 = vadd.f32 %v213_v62, %v123_v51  ;;  %v215_v5 = vpop.f32.mrb[5].mxu0  ;;  %v4691_v13 = vadd.f32 %v2762_v10, %v4669_v41  ;;  %v334_v14 = vpop.f32.mrb[5].mxu1 }
 0x138   :  { %v4688_v8 = vadd.f32 %v215_v5, %v127_v52  ;;  %v4696_v22 = vadd.f32 %v334_v14, %v4669_v41 }
 0x13a   :  { %v219_v11 = vpop.f32.mrb[6].mxu0  ;;  %v2765_v27 = vpop.f32.mrb[6].mxu1 }
 0x13b   :  { %v4693_v19 = vadd.f32 %v219_v11, %v123_v51  ;;  %v221_v20 = vpop.f32.mrb[7].mxu0  ;;  %v4701_v32 = vadd.f32 %v2765_v27, %v4669_v41  ;;  %v344_v33 = vpop.f32.mrb[7].mxu1  ;;  %v204_v27 = vadd.f32 %v203_v45, %v127_v52 }
 0x13c   :  { %v4698_v25 = vadd.f32 %v221_v20, %v127_v52  ;;  %v4706_v37 = vadd.f32 %v344_v33, %v4669_v41  ;;  %v202_v20 = vadd.f32 %v201_v43, %v123_v51 }
 0x13d   :  { %5158 = vst [vmem:[#allocation12_spill] sm:$0xff] %v4701_v32 }
 0x13e   :  { %v225_v28 = vpop.f32.mrb[8].mxu0 }
 0x13f   :  { %v4703_v35 = vadd.f32 %v225_v28, %v123_v51  ;;  %v227_v36 = vpop.f32.mrb[9].mxu0 }
 0x140   :  { %v4708_v40 = vadd.f32 %v227_v36, %v127_v52 }
 0x142   :  { %v231_v42 = vpop.f32.mrb[10].mxu0 }
 0x143   :  { %v4710_v44 = vadd.f32 %v231_v42, %v123_v51  ;;  %v233_v46 = vpop.f32.mrb[11].mxu0 }
 0x144   :  { %v4712_v55 = vadd.f32 %v233_v46, %v127_v52 }
 0x146   :  { %v237_v57 = vpop.f32.mrb[12].mxu0 }
 0x147   :  { %v4714_v61 = vadd.f32 %v237_v57, %v123_v51  ;;  %v239_v62 = vpop.f32.mrb[13].mxu0 }
 0x148   :  { %v4716_v1 = vadd.f32 %v239_v62, %v127_v52 }
 0x14a   :  { %v243_v5 = vpop.f32.mrb[14].mxu0 }
 0x14b   :  { %v4718_v10 = vadd.f32 %v243_v5, %v123_v51  ;;  %v245_v11 = vpop.f32.mrb[15].mxu0 }
 0x14c   :  { %v4720_v14 = vadd.f32 %v245_v11, %v127_v52  ;;  %v4725_v11 = vld [vmem:[%s5152_s4] ss:$0 sm:$0xff] }
 0x14e   :  { %v436_v28 = vpop.f32.mrb[16].mxu0 }
 0x14f   :  { %v542_v33 = vadd.f32 %v436_v28, %v202_v20  ;;  %v522_v36 = vpop.f32.mrb[8].mxu1  ;;  %v2800_v42 = vpop.f32.mrb[17].mxu0 }
 0x150   :  { %v549_v46 = vadd.f32 %v522_v36, %v204_v27  ;;  %v2835_v16 = vpop.f32.mrb[9].mxu1 }
 0x151   :  { %v2273_v0 = vmul.f32 -1.442695, %v542_v33 }
 0x152   :  { %v2274_v57 = vmul.f32 -1.442695, %v549_v46 }
 0x153   :  { %4257 = vpow2.f32 %v2273_v0  ;;  %v315_v0 = vadd.f32 %v4674_v50, %v4669_v41  ;;  %v5160_v41 = vmov 0.0|0.0  }
 0x154   :  { %4259 = vpow2.f32 %v2274_v57  ;;  %v5159_v57 = vmov 0.0  }
 0x15d   :  { %v4258_v32 = vpop.eup %4257 }
 0x15e   :  { %v546_v62 = vadd.f32 1.0, %v4258_v32  ;;  %v4260_v5 = vpop.eup %4259 }
 0x15f   :  { %v553_v43 = vadd.f32 1.0, %v4260_v5 }
 0x160   :  { %4261 = vrcp.f32 %v546_v62 }
 0x161   :  { %4263 = vrcp.f32 %v553_v43 }
 0x16a   :  { %v4262_v20 = vpop.eup %4261 }
 0x16b   :  { %v4264_v32 = vpop.eup %4263 }
 0x16c   :  { %v635_v28 = vsub.f32 1.0, %v4264_v32  ;;  %v637_v42 = vmul.f32 0.0, %v4264_v32 }
 0x16e   :  { %v628_v45 = vpop.f32.mrb[18].mxu0 }
 0x16f   :  { %v629_v51 = vadd.f32 %v4725_v11, %v628_v45  ;;  %v2870_v52 = vpop.f32.mrb[19].mxu0 }
 0x171   :  { %v632_v16 = vmul.f32 %v4262_v20, %v629_v51 }
 0x173   :  { %v633_v27 = vadd.f32 %v632_v16, %v315_v0 }
 0x175   :  { %4265 = vtanh.f32 %v633_v27 }
 0x17f   :  { %v4266_v33 = vpop.eup %4265 }
 0x180   :  { %v636_v36 = vmul.f32 %v4266_v33, %v635_v28 }
 0x182   :  { %v4730_v46 = vadd.f32 %v637_v42, %v636_v36 }
 0x184   :  { %2904 = vmatmul.mubr.f32.vlgmr.msra.gmra.mrb[10].mxu1 %v4730_v46  ;;  %2939 = vmatmul.mubr.f32.vlgmr.msra.gmra.mrb[20].mxu0 %v4730_v46 }
 0x185   :  { %3792 = vmatpush3.bf16.msra.mxu1 %v4590_v6  ;;  %2973 = vmatprep.mubr.msk.f32.mxu1 %vm4441_vm0, %v5159_v57 }
 0x186   :  { %3793 = vmatprep.subr.bf16.mxu1 %v5160_v41  ;;  %3816 = vmatpush3.bf16.msra.mxu0 %v4516_v15 }
 0x187   :  { %3817 = vmatprep.subr.bf16.mxu0 %v5160_v41  ;;  %3008 = vmatprep.mubr.msk.f32.mxu0 %vm4441_vm0, %v5159_v57 }
 0x189   :  { %3795 = vmatpush3.bf16.msra.mxu1 %v4598_v9 }
 0x18a   :  { %3796 = vmatprep.subr.bf16.mxu1 %v5160_v41  ;;  %3819 = vmatpush3.bf16.msra.mxu0 %v4523_v23 }
 0x18b   :  { %3820 = vmatprep.subr.bf16.mxu0 %v5160_v41 }
 0x18d   :  { %3798 = vmatpush3.bf16.msra.mxu1 %v4608_v12 }
 0x18e   :  { %3799 = vmatprep.subr.bf16.mxu1 %v5160_v41  ;;  %3822 = vmatpush3.bf16.msra.mxu0 %v4533_v30 }
 0x18f   :  { %3823 = vmatprep.subr.bf16.mxu0 %v5160_v41 }
 0x191   :  { %3801 = vmatpush3.bf16.msra.mxu1 %v4614_v17 }
 0x192   :  { %3802 = vmatprep.subr.bf16.mxu1 %v5160_v41  ;;  %3825 = vmatpush3.bf16.msra.mxu0 %v4542_v38 }
 0x193   :  { %3826 = vmatprep.subr.bf16.mxu0 %v5160_v41 }
 0x195   :  { %3804 = vmatpush3.bf16.msra.mxu1 %v4620_v21 }
 0x196   :  { %3805 = vmatprep.subr.bf16.mxu1 %v5160_v41  ;;  %3828 = vmatpush3.bf16.msra.mxu0 %v4551_v47 }
 0x197   :  { %3829 = vmatprep.subr.bf16.mxu0 %v5160_v41 }
 0x199   :  { %3807 = vmatpush3.bf16.msra.mxu1 %v4626_v26 }
 0x19a   :  { %3808 = vmatprep.subr.bf16.mxu1 %v5160_v41  ;;  %3831 = vmatpush3.bf16.msra.mxu0 %v4562_v53 }
 0x19b   :  { %3832 = vmatprep.subr.bf16.mxu0 %v5160_v41 }
 0x19d   :  { %3810 = vmatpush3.bf16.msra.mxu1 %v4632_v29 }
 0x19e   :  { %3811 = vmatprep.subr.bf16.mxu1 %v5160_v41  ;;  %3834 = vmatpush3.bf16.msra.mxu0 %v4571_v59 }
 0x19f   :  { %3835 = vmatprep.subr.bf16.mxu0 %v5160_v41 }
 0x1a1   :  { %3813 = vmatpush3.bf16.msra.mxu1 %v4638_v34 }
 0x1a2   :  { %3838 = vmatprep.subr.bf16.mxu1 %v5160_v41  ;;  %3837 = vmatpush3.bf16.msra.mxu0 %v4580_v2 }
 0x1a3   :  { %3862 = vmatprep.subr.bf16.mxu0 %v5160_v41 }
 0x1a4   :  { %2974 = vmatmul.mubr.f32.vlgmr.msra.gmra.mrb[12].mxu1 %v4730_v46 }
 0x1a5   :  { %3840 = vmatpush3.bf16.msra.mxu1 %v4519_v18  ;;  %3043 = vmatprep.mubr.msk.f32.mxu1 %vm4441_vm0, %v5159_v57 }
 0x1a6   :  { %3841 = vmatprep.subr.bf16.mxu1 %v5160_v41 }
 0x1a9   :  { %3843 = vmatpush3.bf16.msra.mxu1 %v4527_v24 }
 0x1aa   :  { %3844 = vmatprep.subr.bf16.mxu1 %v5160_v41 }
 0x1ad   :  { %3846 = vmatpush3.bf16.msra.mxu1 %v4537_v31 }
 0x1ae   :  { %3847 = vmatprep.subr.bf16.mxu1 %v5160_v41 }
 0x1b1   :  { %3849 = vmatpush3.bf16.msra.mxu1 %v4546_v39 }
 0x1b2   :  { %3850 = vmatprep.subr.bf16.mxu1 %v5160_v41 }
 0x1b5   :  { %3852 = vmatpush3.bf16.msra.mxu1 %v4555_v48 }
 0x1b6   :  { %3853 = vmatprep.subr.bf16.mxu1 %v5160_v41 }
 0x1b9   :  { %3855 = vmatpush3.bf16.msra.mxu1 %v4566_v54 }
 0x1ba   :  { %3856 = vmatprep.subr.bf16.mxu1 %v5160_v41 }
 0x1bd   :  { %3858 = vmatpush3.bf16.msra.mxu1 %v4575_v60 }
 0x1be   :  { %3859 = vmatprep.subr.bf16.mxu1 %v5160_v41 }
 0x1c1   :  { %3861 = vmatpush3.bf16.msra.mxu1 %v4584_v3 }
 0x1c2   :  { %3886 = vmatprep.subr.bf16.mxu1 %v5160_v41 }
 0x257   :  { %v705_v50 = vpop.f32.mrb[10].mxu1  ;;  %v775_v62 = vpop.f32.mrb[20].mxu0 }
 0x258   :  { %v779_v5 = vadd.f32 %v705_v50, %v4676_v56  ;;  %v786_v43 = vadd.f32 %v775_v62, %v4678_v58  ;;  %v2905_v45 = vpop.f32.mrb[11].mxu1  ;;  %v2940_v51 = vpop.f32.mrb[21].mxu0 }
 0x25a   :  { %v2276_v52 = vmul.f32 -1.442695, %v779_v5  ;;  %v2277_v20 = vmul.f32 -1.442695, %v786_v43 }
 0x25c   :  { %4267 = vpow2.f32 %v2276_v52 }
 0x25d   :  { %4269 = vpow2.f32 %v2277_v20 }
 0x266   :  { %v4268_v0 = vpop.eup %4267 }
 0x267   :  { %v783_v16 = vadd.f32 1.0, %v4268_v0  ;;  %v4270_v27 = vpop.eup %4269 }
 0x268   :  { %v790_v32 = vadd.f32 1.0, %v4270_v27 }
 0x269   :  { %4271 = vrcp.f32 %v783_v16 }
 0x26a   :  { %4273 = vrcp.f32 %v790_v32 }
 0x273   :  { %v4272_v42 = vpop.eup %4271 }
 0x274   :  { %v4274_v50 = vpop.eup %4273 }
 0x275   :  { %v866_v62 = vsub.f32 1.0, %v4274_v50  ;;  %v868_v45 = vmul.f32 %v4274_v50, %v4730_v46 }
 0x277   :  { %v859_v28 = vpop.f32.mrb[12].mxu1 }
 0x278   :  { %v860_v33 = vadd.f32 %v4725_v11, %v859_v28  ;;  %v2975_v36 = vpop.f32.mrb[13].mxu1 }
 0x27a   :  { %v863_v56 = vmul.f32 %v4272_v42, %v860_v33 }
 0x27c   :  { %v864_v58 = vadd.f32 %v863_v56, %v4672_v49 }
 0x27e   :  { %4275 = vtanh.f32 %v864_v58 }
 0x288   :  { %v4276_v5 = vpop.eup %4275 }
 0x289   :  { %v867_v43 = vmul.f32 %v4276_v5, %v866_v62 }
 0x28b   :  { %v4794_v51 = vadd.f32 %v868_v45, %v867_v43 }
 0x28d   :  { %3009 = vmatmul.mubr.f32.vlgmr.msra.gmra.mrb[22].mxu0 %v4794_v51  ;;  %3044 = vmatmul.mubr.f32.vlgmr.msra.gmra.mrb[14].mxu1 %v4794_v51 }
 0x28e   :  { %3864 = vmatpush3.bf16.msra.mxu0 %v4590_v6  ;;  %3078 = vmatprep.mubr.msk.f32.mxu0 %vm4441_vm0, %v5159_v57 }
 0x28f   :  { %3865 = vmatprep.subr.bf16.mxu0 %v5160_v41  ;;  %3888 = vmatpush3.bf16.msra.mxu1 %v4516_v15 }
 0x290   :  { %3889 = vmatprep.subr.bf16.mxu1 %v5160_v41  ;;  %3113 = vmatprep.mubr.msk.f32.mxu1 %vm4441_vm0, %v5159_v57 }
 0x292   :  { %3867 = vmatpush3.bf16.msra.mxu0 %v4598_v9 }
 0x293   :  { %3868 = vmatprep.subr.bf16.mxu0 %v5160_v41  ;;  %3891 = vmatpush3.bf16.msra.mxu1 %v4523_v23 }
 0x294   :  { %3892 = vmatprep.subr.bf16.mxu1 %v5160_v41 }
 0x296   :  { %3870 = vmatpush3.bf16.msra.mxu0 %v4608_v12 }
 0x297   :  { %3871 = vmatprep.subr.bf16.mxu0 %v5160_v41  ;;  %3894 = vmatpush3.bf16.msra.mxu1 %v4533_v30 }
 0x298   :  { %3895 = vmatprep.subr.bf16.mxu1 %v5160_v41 }
 0x29a   :  { %3873 = vmatpush3.bf16.msra.mxu0 %v4614_v17 }
 0x29b   :  { %3874 = vmatprep.subr.bf16.mxu0 %v5160_v41  ;;  %3897 = vmatpush3.bf16.msra.mxu1 %v4542_v38 }
 0x29c   :  { %3898 = vmatprep.subr.bf16.mxu1 %v5160_v41 }
 0x29e   :  { %3876 = vmatpush3.bf16.msra.mxu0 %v4620_v21 }
 0x29f   :  { %3877 = vmatprep.subr.bf16.mxu0 %v5160_v41  ;;  %3900 = vmatpush3.bf16.msra.mxu1 %v4551_v47 }
 0x2a0   :  { %3901 = vmatprep.subr.bf16.mxu1 %v5160_v41 }
 0x2a2   :  { %3879 = vmatpush3.bf16.msra.mxu0 %v4626_v26 }
 0x2a3   :  { %3880 = vmatprep.subr.bf16.mxu0 %v5160_v41  ;;  %3903 = vmatpush3.bf16.msra.mxu1 %v4562_v53 }
 0x2a4   :  { %3904 = vmatprep.subr.bf16.mxu1 %v5160_v41 }
 0x2a6   :  { %3882 = vmatpush3.bf16.msra.mxu0 %v4632_v29 }
 0x2a7   :  { %3883 = vmatprep.subr.bf16.mxu0 %v5160_v41  ;;  %3906 = vmatpush3.bf16.msra.mxu1 %v4571_v59 }
 0x2a8   :  { %3907 = vmatprep.subr.bf16.mxu1 %v5160_v41 }
 0x2aa   :  { %3885 = vmatpush3.bf16.msra.mxu0 %v4638_v34 }
 0x2ab   :  { %3910 = vmatprep.subr.bf16.mxu0 %v5160_v41  ;;  %3909 = vmatpush3.bf16.msra.mxu1 %v4580_v2 }
 0x2ac   :  { %3934 = vmatprep.subr.bf16.mxu1 %v5160_v41 }
 0x2ad   :  { %3079 = vmatmul.mubr.f32.vlgmr.msra.gmra.mrb[24].mxu0 %v4794_v51 }
 0x2ae   :  { %3912 = vmatpush3.bf16.msra.mxu0 %v4519_v18  ;;  %3148 = vmatprep.mubr.msk.f32.mxu0 %vm4441_vm0, %v5159_v57 }
 0x2af   :  { %3913 = vmatprep.subr.bf16.mxu0 %v5160_v41 }
 0x2b2   :  { %3915 = vmatpush3.bf16.msra.mxu0 %v4527_v24 }
 0x2b3   :  { %3916 = vmatprep.subr.bf16.mxu0 %v5160_v41 }
 0x2b6   :  { %3918 = vmatpush3.bf16.msra.mxu0 %v4537_v31 }
 0x2b7   :  { %3919 = vmatprep.subr.bf16.mxu0 %v5160_v41 }
 0x2ba   :  { %3921 = vmatpush3.bf16.msra.mxu0 %v4546_v39 }
 0x2bb   :  { %3922 = vmatprep.subr.bf16.mxu0 %v5160_v41 }
 0x2be   :  { %3924 = vmatpush3.bf16.msra.mxu0 %v4555_v48 }
 0x2bf   :  { %3925 = vmatprep.subr.bf16.mxu0 %v5160_v41 }
 0x2c2   :  { %3927 = vmatpush3.bf16.msra.mxu0 %v4566_v54 }
 0x2c3   :  { %3928 = vmatprep.subr.bf16.mxu0 %v5160_v41 }
 0x2c6   :  { %3930 = vmatpush3.bf16.msra.mxu0 %v4575_v60 }
 0x2c7   :  { %3931 = vmatprep.subr.bf16.mxu0 %v5160_v41 }
 0x2ca   :  { %3933 = vmatpush3.bf16.msra.mxu0 %v4584_v3 }
 0x2cb   :  { %3958 = vmatprep.subr.bf16.mxu0 %v5160_v41 }
 0x360   :  { %v936_v49 = vpop.f32.mrb[22].mxu0  ;;  %v1006_v46 = vpop.f32.mrb[14].mxu1 }
 0x361   :  { %v1010_v52 = vadd.f32 %v936_v49, %v4683_v4  ;;  %v1017_v20 = vadd.f32 %v1006_v46, %v4688_v8  ;;  %v3010_v0 = vpop.f32.mrb[23].mxu0  ;;  %v3045_v16 = vpop.f32.mrb[15].mxu1 }
 0x363   :  { %v2278_v27 = vmul.f32 -1.442695, %v1010_v52  ;;  %v2279_v32 = vmul.f32 -1.442695, %v1017_v20 }
 0x365   :  { %4277 = vpow2.f32 %v2278_v27 }
 0x366   :  { %4279 = vpow2.f32 %v2279_v32 }
 0x36f   :  { %v4278_v28 = vpop.eup %4277 }
 0x370   :  { %v1014_v33 = vadd.f32 1.0, %v4278_v28  ;;  %v4280_v36 = vpop.eup %4279 }
 0x371   :  { %v1021_v42 = vadd.f32 1.0, %v4280_v36 }
 0x372   :  { %4281 = vrcp.f32 %v1014_v33 }
 0x373   :  { %4283 = vrcp.f32 %v1021_v42 }
 0x37c   :  { %v4282_v62 = vpop.eup %4281 }
 0x37d   :  { %v4284_v5 = vpop.eup %4283 }
 0x37e   :  { %v1097_v43 = vsub.f32 1.0, %v4284_v5  ;;  %v1099_v46 = vmul.f32 %v4284_v5, %v4794_v51 }
 0x380   :  { %v1090_v56 = vpop.f32.mrb[24].mxu0 }
 0x381   :  { %v1091_v58 = vadd.f32 %v4725_v11, %v1090_v56  ;;  %v3080_v50 = vpop.f32.mrb[25].mxu0 }
 0x383   :  { %v1094_v4 = vmul.f32 %v4282_v62, %v1091_v58 }
 0x385   :  { %v1095_v8 = vadd.f32 %v1094_v4, %v4686_v7 }
 0x387   :  { %4285 = vtanh.f32 %v1095_v8 }
 0x391   :  { %v4286_v45 = vpop.eup %4285 }
 0x392   :  { %v1098_v49 = vmul.f32 %v4286_v45, %v1097_v43 }
 0x394   :  { %v4858_v52 = vadd.f32 %v1099_v46, %v1098_v49 }
 0x396   :  { %3114 = vmatmul.mubr.f32.vlgmr.msra.gmra.mrb[16].mxu1 %v4858_v52  ;;  %3149 = vmatmul.mubr.f32.vlgmr.msra.gmra.mrb[26].mxu0 %v4858_v52 }
 0x397   :  { %3936 = vmatpush3.bf16.msra.mxu1 %v4590_v6  ;;  %3183 = vmatprep.mubr.msk.f32.mxu1 %vm4441_vm0, %v5159_v57 }
 0x398   :  { %3937 = vmatprep.subr.bf16.mxu1 %v5160_v41  ;;  %3960 = vmatpush3.bf16.msra.mxu0 %v4516_v15 }
 0x399   :  { %3961 = vmatprep.subr.bf16.mxu0 %v5160_v41  ;;  %3218 = vmatprep.mubr.msk.f32.mxu0 %vm4441_vm0, %v5159_v57 }
 0x39b   :  { %3939 = vmatpush3.bf16.msra.mxu1 %v4598_v9 }
 0x39c   :  { %3940 = vmatprep.subr.bf16.mxu1 %v5160_v41  ;;  %3963 = vmatpush3.bf16.msra.mxu0 %v4523_v23 }
 0x39d   :  { %3964 = vmatprep.subr.bf16.mxu0 %v5160_v41 }
 0x39f   :  { %3942 = vmatpush3.bf16.msra.mxu1 %v4608_v12 }
 0x3a0   :  { %3943 = vmatprep.subr.bf16.mxu1 %v5160_v41  ;;  %3966 = vmatpush3.bf16.msra.mxu0 %v4533_v30 }
 0x3a1   :  { %3967 = vmatprep.subr.bf16.mxu0 %v5160_v41 }
 0x3a3   :  { %3945 = vmatpush3.bf16.msra.mxu1 %v4614_v17 }
 0x3a4   :  { %3946 = vmatprep.subr.bf16.mxu1 %v5160_v41  ;;  %3969 = vmatpush3.bf16.msra.mxu0 %v4542_v38 }
 0x3a5   :  { %3970 = vmatprep.subr.bf16.mxu0 %v5160_v41 }
 0x3a7   :  { %3948 = vmatpush3.bf16.msra.mxu1 %v4620_v21 }
 0x3a8   :  { %3949 = vmatprep.subr.bf16.mxu1 %v5160_v41  ;;  %3972 = vmatpush3.bf16.msra.mxu0 %v4551_v47 }
 0x3a9   :  { %3973 = vmatprep.subr.bf16.mxu0 %v5160_v41 }
 0x3ab   :  { %3951 = vmatpush3.bf16.msra.mxu1 %v4626_v26 }
 0x3ac   :  { %3952 = vmatprep.subr.bf16.mxu1 %v5160_v41  ;;  %3975 = vmatpush3.bf16.msra.mxu0 %v4562_v53 }
 0x3ad   :  { %3976 = vmatprep.subr.bf16.mxu0 %v5160_v41 }
 0x3af   :  { %3954 = vmatpush3.bf16.msra.mxu1 %v4632_v29 }
 0x3b0   :  { %3955 = vmatprep.subr.bf16.mxu1 %v5160_v41  ;;  %3978 = vmatpush3.bf16.msra.mxu0 %v4571_v59 }
 0x3b1   :  { %3979 = vmatprep.subr.bf16.mxu0 %v5160_v41 }
 0x3b3   :  { %3957 = vmatpush3.bf16.msra.mxu1 %v4638_v34 }
 0x3b4   :  { %3982 = vmatprep.subr.bf16.mxu1 %v5160_v41  ;;  %3981 = vmatpush3.bf16.msra.mxu0 %v4580_v2 }
 0x3b5   :  { %4006 = vmatprep.subr.bf16.mxu0 %v5160_v41 }
 0x3b6   :  { %3184 = vmatmul.mubr.f32.vlgmr.msra.gmra.mrb[18].mxu1 %v4858_v52 }
 0x3b7   :  { %3984 = vmatpush3.bf16.msra.mxu1 %v4519_v18  ;;  %3253 = vmatprep.mubr.msk.f32.mxu1 %vm4441_vm0, %v5159_v57 }
 0x3b8   :  { %3985 = vmatprep.subr.bf16.mxu1 %v5160_v41 }
 0x3bb   :  { %3987 = vmatpush3.bf16.msra.mxu1 %v4527_v24 }
 0x3bc   :  { %3988 = vmatprep.subr.bf16.mxu1 %v5160_v41 }
 0x3bf   :  { %3990 = vmatpush3.bf16.msra.mxu1 %v4537_v31 }
 0x3c0   :  { %3991 = vmatprep.subr.bf16.mxu1 %v5160_v41 }
 0x3c3   :  { %3993 = vmatpush3.bf16.msra.mxu1 %v4546_v39 }
 0x3c4   :  { %3994 = vmatprep.subr.bf16.mxu1 %v5160_v41 }
 0x3c7   :  { %3996 = vmatpush3.bf16.msra.mxu1 %v4555_v48 }
 0x3c8   :  { %3997 = vmatprep.subr.bf16.mxu1 %v5160_v41 }
 0x3cb   :  { %3999 = vmatpush3.bf16.msra.mxu1 %v4566_v54 }
 0x3cc   :  { %4000 = vmatprep.subr.bf16.mxu1 %v5160_v41 }
 0x3cf   :  { %4002 = vmatpush3.bf16.msra.mxu1 %v4575_v60 }
 0x3d0   :  { %4003 = vmatprep.subr.bf16.mxu1 %v5160_v41 }
 0x3d3   :  { %4005 = vmatpush3.bf16.msra.mxu1 %v4584_v3 }
 0x3d4   :  { %4030 = vmatprep.subr.bf16.mxu1 %v5160_v41 }
 0x469   :  { %v1167_v7 = vpop.f32.mrb[16].mxu1  ;;  %v1237_v51 = vpop.f32.mrb[26].mxu0 }
 0x46a   :  { %v1241_v20 = vadd.f32 %v1167_v7, %v4693_v19  ;;  %v1248_v0 = vadd.f32 %v1237_v51, %v4698_v25  ;;  %v3115_v16 = vpop.f32.mrb[17].mxu1  ;;  %v3150_v27 = vpop.f32.mrb[27].mxu0 }
 0x46c   :  { %v2280_v32 = vmul.f32 -1.442695, %v1241_v20  ;;  %v2281_v28 = vmul.f32 -1.442695, %v1248_v0 }
 0x46e   :  { %4287 = vpow2.f32 %v2280_v32 }
 0x46f   :  { %4289 = vpow2.f32 %v2281_v28 }
 0x478   :  { %v4288_v33 = vpop.eup %4287 }
 0x479   :  { %v1245_v36 = vadd.f32 1.0, %v4288_v33  ;;  %v4290_v42 = vpop.eup %4289 }
 0x47a   :  { %v1252_v56 = vadd.f32 1.0, %v4290_v42 }
 0x47b   :  { %4291 = vrcp.f32 %v1245_v36 }
 0x47c   :  { %4293 = vrcp.f32 %v1252_v56 }
 0x485   :  { %v4292_v4 = vpop.eup %4291 }
 0x486   :  { %v4294_v8 = vpop.eup %4293 }
 0x487   :  { %v1328_v5 = vsub.f32 1.0, %v4294_v8  ;;  %v1330_v49 = vmul.f32 %v4294_v8, %v4858_v52 }
 0x489   :  { %v1321_v58 = vpop.f32.mrb[18].mxu1 }
 0x48a   :  { %v1322_v50 = vadd.f32 %v4725_v11, %v1321_v58  ;;  %v3185_v62 = vpop.f32.mrb[19].mxu1 }
 0x48c   :  { %v1325_v19 = vmul.f32 %v4292_v4, %v1322_v50 }
 0x48e   :  { %v1326_v25 = vadd.f32 %v1325_v19, %v4681_v63 }
 0x490   :  { %4295 = vtanh.f32 %v1326_v25 }
 0x49a   :  { %v4296_v43 = vpop.eup %4295 }
 0x49b   :  { %v1329_v45 = vmul.f32 %v4296_v43, %v1328_v5 }
 0x49d   :  { %v4922_v46 = vadd.f32 %v1330_v49, %v1329_v45 }
 0x49f   :  { %3219 = vmatmul.mubr.f32.vlgmr.msra.gmra.mrb[28].mxu0 %v4922_v46  ;;  %3254 = vmatmul.mubr.f32.vlgmr.msra.gmra.mrb[20].mxu1 %v4922_v46 }
 0x4a0   :  { %4008 = vmatpush3.bf16.msra.mxu0 %v4590_v6  ;;  %3288 = vmatprep.mubr.msk.f32.mxu0 %vm4441_vm0, %v5159_v57 }
 0x4a1   :  { %4009 = vmatprep.subr.bf16.mxu0 %v5160_v41  ;;  %4032 = vmatpush3.bf16.msra.mxu1 %v4516_v15 }
 0x4a2   :  { %4033 = vmatprep.subr.bf16.mxu1 %v5160_v41  ;;  %3323 = vmatprep.mubr.msk.f32.mxu1 %vm4441_vm0, %v5159_v57 }
 0x4a4   :  { %4011 = vmatpush3.bf16.msra.mxu0 %v4598_v9 }
 0x4a5   :  { %4012 = vmatprep.subr.bf16.mxu0 %v5160_v41  ;;  %4035 = vmatpush3.bf16.msra.mxu1 %v4523_v23 }
 0x4a6   :  { %4036 = vmatprep.subr.bf16.mxu1 %v5160_v41 }
 0x4a8   :  { %4014 = vmatpush3.bf16.msra.mxu0 %v4608_v12 }
 0x4a9   :  { %4015 = vmatprep.subr.bf16.mxu0 %v5160_v41  ;;  %4038 = vmatpush3.bf16.msra.mxu1 %v4533_v30 }
 0x4aa   :  { %4039 = vmatprep.subr.bf16.mxu1 %v5160_v41 }
 0x4ac   :  { %4017 = vmatpush3.bf16.msra.mxu0 %v4614_v17 }
 0x4ad   :  { %4018 = vmatprep.subr.bf16.mxu0 %v5160_v41  ;;  %4041 = vmatpush3.bf16.msra.mxu1 %v4542_v38 }
 0x4ae   :  { %4042 = vmatprep.subr.bf16.mxu1 %v5160_v41 }
 0x4b0   :  { %4020 = vmatpush3.bf16.msra.mxu0 %v4620_v21 }
 0x4b1   :  { %4021 = vmatprep.subr.bf16.mxu0 %v5160_v41  ;;  %4044 = vmatpush3.bf16.msra.mxu1 %v4551_v47 }
 0x4b2   :  { %4045 = vmatprep.subr.bf16.mxu1 %v5160_v41 }
 0x4b4   :  { %4023 = vmatpush3.bf16.msra.mxu0 %v4626_v26 }
 0x4b5   :  { %4024 = vmatprep.subr.bf16.mxu0 %v5160_v41  ;;  %4047 = vmatpush3.bf16.msra.mxu1 %v4562_v53 }
 0x4b6   :  { %4048 = vmatprep.subr.bf16.mxu1 %v5160_v41 }
 0x4b8   :  { %4026 = vmatpush3.bf16.msra.mxu0 %v4632_v29 }
 0x4b9   :  { %4027 = vmatprep.subr.bf16.mxu0 %v5160_v41  ;;  %4050 = vmatpush3.bf16.msra.mxu1 %v4571_v59 }
 0x4ba   :  { %4051 = vmatprep.subr.bf16.mxu1 %v5160_v41 }
 0x4bc   :  { %4029 = vmatpush3.bf16.msra.mxu0 %v4638_v34 }
 0x4bd   :  { %4054 = vmatprep.subr.bf16.mxu0 %v5160_v41  ;;  %4053 = vmatpush3.bf16.msra.mxu1 %v4580_v2 }
 0x4be   :  { %4078 = vmatprep.subr.bf16.mxu1 %v5160_v41 }
 0x4bf   :  { %3289 = vmatmul.mubr.f32.vlgmr.msra.gmra.mrb[30].mxu0 %v4922_v46 }
 0x4c0   :  { %4056 = vmatpush3.bf16.msra.mxu0 %v4519_v18  ;;  %3358 = vmatprep.mubr.msk.f32.mxu0 %vm4441_vm0, %v5159_v57 }
 0x4c1   :  { %4057 = vmatprep.subr.bf16.mxu0 %v5160_v41 }
 0x4c4   :  { %4059 = vmatpush3.bf16.msra.mxu0 %v4527_v24 }
 0x4c5   :  { %4060 = vmatprep.subr.bf16.mxu0 %v5160_v41 }
 0x4c8   :  { %4062 = vmatpush3.bf16.msra.mxu0 %v4537_v31 }
 0x4c9   :  { %4063 = vmatprep.subr.bf16.mxu0 %v5160_v41 }
 0x4cc   :  { %4065 = vmatpush3.bf16.msra.mxu0 %v4546_v39 }
 0x4cd   :  { %4066 = vmatprep.subr.bf16.mxu0 %v5160_v41 }
 0x4d0   :  { %4068 = vmatpush3.bf16.msra.mxu0 %v4555_v48 }
 0x4d1   :  { %4069 = vmatprep.subr.bf16.mxu0 %v5160_v41 }
 0x4d4   :  { %4071 = vmatpush3.bf16.msra.mxu0 %v4566_v54 }
 0x4d5   :  { %4072 = vmatprep.subr.bf16.mxu0 %v5160_v41 }
 0x4d8   :  { %4074 = vmatpush3.bf16.msra.mxu0 %v4575_v60 }
 0x4d9   :  { %4075 = vmatprep.subr.bf16.mxu0 %v5160_v41 }
 0x4dc   :  { %4077 = vmatpush3.bf16.msra.mxu0 %v4584_v3 }
 0x4dd   :  { %4102 = vmatprep.subr.bf16.mxu0 %v5160_v41 }
 0x572   :  { %v1398_v63 = vpop.f32.mrb[28].mxu0  ;;  %v1468_v52 = vpop.f32.mrb[20].mxu1 }
 0x573   :  { %v1472_v7 = vadd.f32 %v1398_v63, %v4703_v35  ;;  %v1479_v51 = vadd.f32 %v1468_v52, %v4708_v40  ;;  %v3220_v20 = vpop.f32.mrb[29].mxu0  ;;  %v3255_v0 = vpop.f32.mrb[21].mxu1 }
 0x575   :  { %v2282_v16 = vmul.f32 -1.442695, %v1472_v7  ;;  %v2283_v27 = vmul.f32 -1.442695, %v1479_v51 }
 0x577   :  { %4297 = vpow2.f32 %v2282_v16 }
 0x578   :  { %4299 = vpow2.f32 %v2283_v27 }
 0x581   :  { %v4298_v32 = vpop.eup %4297 }
 0x582   :  { %v1476_v28 = vadd.f32 1.0, %v4298_v32  ;;  %v4300_v33 = vpop.eup %4299 }
 0x583   :  { %v1483_v36 = vadd.f32 1.0, %v4300_v33 }
 0x584   :  { %4301 = vrcp.f32 %v1476_v28 }
 0x585   :  { %4303 = vrcp.f32 %v1483_v36 }
 0x58e   :  { %v4302_v50 = vpop.eup %4301 }
 0x58f   :  { %v4304_v62 = vpop.eup %4303 }
 0x590   :  { %v1559_v4 = vsub.f32 1.0, %v4304_v62  ;;  %v1561_v8 = vmul.f32 %v4304_v62, %v4922_v46 }
 0x592   :  { %v1552_v42 = vpop.f32.mrb[30].mxu0 }
 0x593   :  { %v1553_v56 = vadd.f32 %v4725_v11, %v1552_v42  ;;  %v3290_v58 = vpop.f32.mrb[31].mxu0 }
 0x595   :  { %v1556_v35 = vmul.f32 %v4302_v50, %v1553_v56 }
 0x597   :  { %v1557_v40 = vadd.f32 %v1556_v35, %v4696_v22 }
 0x599   :  { %4305 = vtanh.f32 %v1557_v40 }
 0x5a3   :  { %v4306_v19 = vpop.eup %4305 }
 0x5a4   :  { %v1560_v25 = vmul.f32 %v4306_v19, %v1559_v4 }
 0x5a6   :  { %v4986_v5 = vadd.f32 %v1561_v8, %v1560_v25 }
 0x5a8   :  { %3324 = vmatmul.mubr.f32.vlgmr.msra.gmra.mrb[22].mxu1 %v4986_v5  ;;  %3359 = vmatmul.mubr.f32.vlgmr.msra.gmra.mrb[32].mxu0 %v4986_v5 }
 0x5a9   :  { %4080 = vmatpush3.bf16.msra.mxu1 %v4590_v6  ;;  %3393 = vmatprep.mubr.msk.f32.mxu1 %vm4441_vm0, %v5159_v57 }
 0x5aa   :  { %4081 = vmatprep.subr.bf16.mxu1 %v5160_v41  ;;  %4104 = vmatpush3.bf16.msra.mxu0 %v4516_v15 }
 0x5ab   :  { %4105 = vmatprep.subr.bf16.mxu0 %v5160_v41  ;;  %3428 = vmatprep.mubr.msk.f32.mxu0 %vm4441_vm0, %v5159_v57 }
 0x5ad   :  { %4083 = vmatpush3.bf16.msra.mxu1 %v4598_v9 }
 0x5ae   :  { %4084 = vmatprep.subr.bf16.mxu1 %v5160_v41  ;;  %4107 = vmatpush3.bf16.msra.mxu0 %v4523_v23 }
 0x5af   :  { %4108 = vmatprep.subr.bf16.mxu0 %v5160_v41 }
 0x5b1   :  { %4086 = vmatpush3.bf16.msra.mxu1 %v4608_v12 }
 0x5b2   :  { %4087 = vmatprep.subr.bf16.mxu1 %v5160_v41  ;;  %4110 = vmatpush3.bf16.msra.mxu0 %v4533_v30 }
 0x5b3   :  { %4111 = vmatprep.subr.bf16.mxu0 %v5160_v41 }
 0x5b5   :  { %4089 = vmatpush3.bf16.msra.mxu1 %v4614_v17 }
 0x5b6   :  { %4090 = vmatprep.subr.bf16.mxu1 %v5160_v41  ;;  %4113 = vmatpush3.bf16.msra.mxu0 %v4542_v38 }
 0x5b7   :  { %4114 = vmatprep.subr.bf16.mxu0 %v5160_v41 }
 0x5b9   :  { %4092 = vmatpush3.bf16.msra.mxu1 %v4620_v21 }
 0x5ba   :  { %4093 = vmatprep.subr.bf16.mxu1 %v5160_v41  ;;  %4116 = vmatpush3.bf16.msra.mxu0 %v4551_v47 }
 0x5bb   :  { %4117 = vmatprep.subr.bf16.mxu0 %v5160_v41 }
 0x5bd   :  { %4095 = vmatpush3.bf16.msra.mxu1 %v4626_v26 }
 0x5be   :  { %4096 = vmatprep.subr.bf16.mxu1 %v5160_v41  ;;  %4119 = vmatpush3.bf16.msra.mxu0 %v4562_v53 }
 0x5bf   :  { %4120 = vmatprep.subr.bf16.mxu0 %v5160_v41 }
 0x5c1   :  { %4098 = vmatpush3.bf16.msra.mxu1 %v4632_v29 }
 0x5c2   :  { %4099 = vmatprep.subr.bf16.mxu1 %v5160_v41  ;;  %4122 = vmatpush3.bf16.msra.mxu0 %v4571_v59 }
 0x5c3   :  { %4123 = vmatprep.subr.bf16.mxu0 %v5160_v41 }
 0x5c5   :  { %4101 = vmatpush3.bf16.msra.mxu1 %v4638_v34 }
 0x5c6   :  { %4126 = vmatprep.subr.bf16.mxu1 %v5160_v41  ;;  %4125 = vmatpush3.bf16.msra.mxu0 %v4580_v2 }
 0x5c7   :  { %4150 = vmatprep.subr.bf16.mxu0 %v5160_v41 }
 0x5c8   :  { %3394 = vmatmul.mubr.f32.vlgmr.msra.gmra.mrb[24].mxu1 %v4986_v5 }
 0x5c9   :  { %4128 = vmatpush3.bf16.msra.mxu1 %v4519_v18  ;;  %3463 = vmatprep.mubr.msk.f32.mxu1 %vm4441_vm0, %v5159_v57 }
 0x5ca   :  { %4129 = vmatprep.subr.bf16.mxu1 %v5160_v41 }
 0x5cd   :  { %4131 = vmatpush3.bf16.msra.mxu1 %v4527_v24 }
 0x5ce   :  { %4132 = vmatprep.subr.bf16.mxu1 %v5160_v41 }
 0x5d1   :  { %4134 = vmatpush3.bf16.msra.mxu1 %v4537_v31 }
 0x5d2   :  { %4135 = vmatprep.subr.bf16.mxu1 %v5160_v41 }
 0x5d5   :  { %4137 = vmatpush3.bf16.msra.mxu1 %v4546_v39 }
 0x5d6   :  { %4138 = vmatprep.subr.bf16.mxu1 %v5160_v41 }
 0x5d9   :  { %4140 = vmatpush3.bf16.msra.mxu1 %v4555_v48 }
 0x5da   :  { %4141 = vmatprep.subr.bf16.mxu1 %v5160_v41 }
 0x5dd   :  { %4143 = vmatpush3.bf16.msra.mxu1 %v4566_v54 }
 0x5de   :  { %4144 = vmatprep.subr.bf16.mxu1 %v5160_v41 }
 0x5e1   :  { %4146 = vmatpush3.bf16.msra.mxu1 %v4575_v60 }
 0x5e2   :  { %4147 = vmatprep.subr.bf16.mxu1 %v5160_v41 }
 0x5e5   :  { %4149 = vmatpush3.bf16.msra.mxu1 %v4584_v3 }
 0x5e6   :  { %4174 = vmatprep.subr.bf16.mxu1 %v5160_v41 }
 0x67b   :  { %v1629_v22 = vpop.f32.mrb[22].mxu1  ;;  %v1699_v43 = vpop.f32.mrb[32].mxu0 }
 0x67c   :  { %v1703_v45 = vadd.f32 %v1629_v22, %v4710_v44  ;;  %v1710_v49 = vadd.f32 %v1699_v43, %v4712_v55  ;;  %v3325_v46 = vpop.f32.mrb[23].mxu1  ;;  %v3360_v63 = vpop.f32.mrb[33].mxu0 }
 0x67e   :  { %v2284_v52 = vmul.f32 -1.442695, %v1703_v45  ;;  %v2285_v7 = vmul.f32 -1.442695, %v1710_v49  ;;  %v5161_v45 = vld [vmem:[#allocation12_spill] sm:$0xff] }
 0x680   :  { %4307 = vpow2.f32 %v2284_v52 }
 0x681   :  { %4309 = vpow2.f32 %v2285_v7 }
 0x68a   :  { %v4308_v51 = vpop.eup %4307 }
 0x68b   :  { %v1707_v20 = vadd.f32 1.0, %v4308_v51  ;;  %v4310_v0 = vpop.eup %4309 }
 0x68c   :  { %v1714_v16 = vadd.f32 1.0, %v4310_v0 }
 0x68d   :  { %4311 = vrcp.f32 %v1707_v20 }
 0x68e   :  { %4313 = vrcp.f32 %v1714_v16 }
 0x697   :  { %v4312_v33 = vpop.eup %4311 }
 0x698   :  { %v4314_v36 = vpop.eup %4313 }
 0x699   :  { %v1790_v42 = vsub.f32 1.0, %v4314_v36  ;;  %v1792_v50 = vmul.f32 %v4314_v36, %v4986_v5 }
 0x69b   :  { %v1783_v27 = vpop.f32.mrb[24].mxu1 }
 0x69c   :  { %v1784_v32 = vadd.f32 %v4725_v11, %v1783_v27  ;;  %v3395_v28 = vpop.f32.mrb[25].mxu1 }
 0x69e   :  { %v1787_v44 = vmul.f32 %v4312_v33, %v1784_v32 }
 0x6a0   :  { %v1788_v55 = vadd.f32 %v1787_v44, %v4691_v13 }
 0x6a2   :  { %4315 = vtanh.f32 %v1788_v55 }
 0x6ac   :  { %v4316_v56 = vpop.eup %4315 }
 0x6ad   :  { %v1791_v58 = vmul.f32 %v4316_v56, %v1790_v42 }
 0x6af   :  { %v5050_v35 = vadd.f32 %v1792_v50, %v1791_v58 }
 0x6b1   :  { %3429 = vmatmul.mubr.f32.vlgmr.msra.gmra.mrb[34].mxu0 %v5050_v35  ;;  %3464 = vmatmul.mubr.f32.vlgmr.msra.gmra.mrb[26].mxu1 %v5050_v35 }
 0x6b2   :  { %4152 = vmatpush3.bf16.msra.mxu0 %v4590_v6  ;;  %3498 = vmatprep.mubr.msk.f32.mxu0 %vm4441_vm0, %v5159_v57 }
 0x6b3   :  { %4153 = vmatprep.subr.bf16.mxu0 %v5160_v41  ;;  %4176 = vmatpush3.bf16.msra.mxu1 %v4516_v15 }
 0x6b4   :  { %4177 = vmatprep.subr.bf16.mxu1 %v5160_v41  ;;  %3533 = vmatprep.mubr.msk.f32.mxu1 %vm4441_vm0, %v5159_v57 }
 0x6b6   :  { %4155 = vmatpush3.bf16.msra.mxu0 %v4598_v9 }
 0x6b7   :  { %4156 = vmatprep.subr.bf16.mxu0 %v5160_v41  ;;  %4179 = vmatpush3.bf16.msra.mxu1 %v4523_v23 }
 0x6b8   :  { %4180 = vmatprep.subr.bf16.mxu1 %v5160_v41 }
 0x6ba   :  { %4158 = vmatpush3.bf16.msra.mxu0 %v4608_v12 }
 0x6bb   :  { %4159 = vmatprep.subr.bf16.mxu0 %v5160_v41  ;;  %4182 = vmatpush3.bf16.msra.mxu1 %v4533_v30 }
 0x6bc   :  { %4183 = vmatprep.subr.bf16.mxu1 %v5160_v41 }
 0x6be   :  { %4161 = vmatpush3.bf16.msra.mxu0 %v4614_v17 }
 0x6bf   :  { %4162 = vmatprep.subr.bf16.mxu0 %v5160_v41  ;;  %4185 = vmatpush3.bf16.msra.mxu1 %v4542_v38 }
 0x6c0   :  { %4186 = vmatprep.subr.bf16.mxu1 %v5160_v41 }
 0x6c2   :  { %4164 = vmatpush3.bf16.msra.mxu0 %v4620_v21 }
 0x6c3   :  { %4165 = vmatprep.subr.bf16.mxu0 %v5160_v41  ;;  %4188 = vmatpush3.bf16.msra.mxu1 %v4551_v47 }
 0x6c4   :  { %4189 = vmatprep.subr.bf16.mxu1 %v5160_v41 }
 0x6c6   :  { %4167 = vmatpush3.bf16.msra.mxu0 %v4626_v26 }
 0x6c7   :  { %4168 = vmatprep.subr.bf16.mxu0 %v5160_v41  ;;  %4191 = vmatpush3.bf16.msra.mxu1 %v4562_v53 }
 0x6c8   :  { %4192 = vmatprep.subr.bf16.mxu1 %v5160_v41 }
 0x6ca   :  { %4170 = vmatpush3.bf16.msra.mxu0 %v4632_v29 }
 0x6cb   :  { %4171 = vmatprep.subr.bf16.mxu0 %v5160_v41  ;;  %4194 = vmatpush3.bf16.msra.mxu1 %v4571_v59 }
 0x6cc   :  { %4195 = vmatprep.subr.bf16.mxu1 %v5160_v41 }
 0x6ce   :  { %4173 = vmatpush3.bf16.msra.mxu0 %v4638_v34 }
 0x6cf   :  { %4198 = vmatprep.subr.bf16.mxu0 %v5160_v41  ;;  %4197 = vmatpush3.bf16.msra.mxu1 %v4580_v2 }
 0x6d0   :  { %4222 = vmatprep.subr.bf16.mxu1 %v5160_v41 }
 0x6d1   :  { %3499 = vmatmul.mubr.f32.vlgmr.msra.gmra.mrb[36].mxu0 %v5050_v35 }
 0x6d2   :  { %4200 = vmatpush3.bf16.msra.mxu0 %v4519_v18  ;;  %3568 = vmatprep.mubr.msk.f32.mxu0 %vm4441_vm0, %v5159_v57 }
 0x6d3   :  { %4201 = vmatprep.subr.bf16.mxu0 %v5160_v41 }
 0x6d6   :  { %4203 = vmatpush3.bf16.msra.mxu0 %v4527_v24 }
 0x6d7   :  { %4204 = vmatprep.subr.bf16.mxu0 %v5160_v41 }
 0x6da   :  { %4206 = vmatpush3.bf16.msra.mxu0 %v4537_v31 }
 0x6db   :  { %4207 = vmatprep.subr.bf16.mxu0 %v5160_v41 }
 0x6de   :  { %4209 = vmatpush3.bf16.msra.mxu0 %v4546_v39 }
 0x6df   :  { %4210 = vmatprep.subr.bf16.mxu0 %v5160_v41 }
 0x6e2   :  { %4212 = vmatpush3.bf16.msra.mxu0 %v4555_v48 }
 0x6e3   :  { %4213 = vmatprep.subr.bf16.mxu0 %v5160_v41 }
 0x6e6   :  { %4215 = vmatpush3.bf16.msra.mxu0 %v4566_v54 }
 0x6e7   :  { %4216 = vmatprep.subr.bf16.mxu0 %v5160_v41 }
 0x6ea   :  { %4218 = vmatpush3.bf16.msra.mxu0 %v4575_v60 }
 0x6eb   :  { %4219 = vmatprep.subr.bf16.mxu0 %v5160_v41 }
 0x6ee   :  { %4221 = vmatpush3.bf16.msra.mxu0 %v4584_v3 }
 0x784   :  { %v1860_v15 = vpop.f32.mrb[34].mxu0  ;;  %v1930_v18 = vpop.f32.mrb[26].mxu1 }
 0x785   :  { %v1934_v23 = vadd.f32 %v1860_v15, %v4714_v61  ;;  %v1941_v24 = vadd.f32 %v1930_v18, %v4716_v1  ;;  %v3430_v30 = vpop.f32.mrb[35].mxu0  ;;  %v3465_v31 = vpop.f32.mrb[27].mxu1 }
 0x787   :  { %v2286_v38 = vmul.f32 -1.442695, %v1934_v23  ;;  %v2287_v39 = vmul.f32 -1.442695, %v1941_v24 }
 0x789   :  { %4317 = vpow2.f32 %v2286_v38 }
 0x78a   :  { %4319 = vpow2.f32 %v2287_v39 }
 0x793   :  { %v4318_v47 = vpop.eup %4317 }
 0x794   :  { %v1938_v48 = vadd.f32 1.0, %v4318_v47  ;;  %v4320_v53 = vpop.eup %4319 }
 0x795   :  { %v1945_v54 = vadd.f32 1.0, %v4320_v53 }
 0x796   :  { %4321 = vrcp.f32 %v1938_v48 }
 0x797   :  { %4323 = vrcp.f32 %v1945_v54 }
 0x7a0   :  { %v4322_v3 = vpop.eup %4321 }
 0x7a1   :  { %v4324_v1 = vpop.eup %4323 }
 0x7a2   :  { %v2021_v40 = vsub.f32 1.0, %v4324_v1  ;;  %v2023_v19 = vmul.f32 %v4324_v1, %v5050_v35 }
 0x7a4   :  { %v2014_v59 = vpop.f32.mrb[36].mxu0 }
 0x7a5   :  { %v2015_v60 = vadd.f32 %v4725_v11, %v2014_v59  ;;  %v3500_v2 = vpop.f32.mrb[37].mxu0 }
 0x7a7   :  { %v2018_v13 = vmul.f32 %v4322_v3, %v2015_v60 }
 0x7a9   :  { %v2019_v61 = vadd.f32 %v2018_v13, %v4706_v37 }
 0x7ab   :  { %4325 = vtanh.f32 %v2019_v61 }
 0x7b5   :  { %v4326_v62 = vpop.eup %4325 }
 0x7b6   :  { %v2022_v4 = vmul.f32 %v4326_v62, %v2021_v40 }
 0x7b8   :  { %v2024_v25 = vadd.f32 %v2023_v19, %v2022_v4 }
 0x7ba   :  { %3534 = vmatmul.mubr.f32.vlgmr.msra.gmra.mrb[28].mxu1 %v2024_v25  ;;  %3569 = vmatmul.mubr.f32.vlgmr.msra.gmra.mrb[38].mxu0 %v2024_v25 }
 0x7bb   :  { %4224 = vmatpush3.bf16.msra.mxu1 %v4590_v6  ;;  %3603 = vmatprep.mubr.msk.f32.mxu1 %vm4441_vm0, %v5159_v57 }
 0x7bc   :  { %4225 = vmatprep.subr.bf16.mxu1 %v5160_v41 }
 0x7bf   :  { %4227 = vmatpush3.bf16.msra.mxu1 %v4598_v9 }
 0x7c0   :  { %4228 = vmatprep.subr.bf16.mxu1 %v5160_v41 }
 0x7c3   :  { %4230 = vmatpush3.bf16.msra.mxu1 %v4608_v12 }
 0x7c4   :  { %4231 = vmatprep.subr.bf16.mxu1 %v5160_v41 }
 0x7c7   :  { %4233 = vmatpush3.bf16.msra.mxu1 %v4614_v17 }
 0x7c8   :  { %4234 = vmatprep.subr.bf16.mxu1 %v5160_v41 }
 0x7cb   :  { %4236 = vmatpush3.bf16.msra.mxu1 %v4620_v21 }
 0x7cc   :  { %4237 = vmatprep.subr.bf16.mxu1 %v5160_v41 }
 0x7cf   :  { %4239 = vmatpush3.bf16.msra.mxu1 %v4626_v26 }
 0x7d0   :  { %4240 = vmatprep.subr.bf16.mxu1 %v5160_v41 }
 0x7d3   :  { %4242 = vmatpush3.bf16.msra.mxu1 %v4632_v29 }
 0x7d4   :  { %4243 = vmatprep.subr.bf16.mxu1 %v5160_v41 }
 0x7d7   :  { %4245 = vmatpush3.bf16.msra.mxu1 %v4638_v34  ;;  %v4337_v34 = vld [vmem:[%s5152_s4] ss:$0 sm:$0xff] }
 0x7da   :  { %3604 = vmatmul.mubr.f32.vlgmr.msra.gmra.mrb[30].mxu1 %v2024_v25 }
 0x88d   :  { %v2091_v6 = vpop.f32.mrb[28].mxu1  ;;  %v2161_v9 = vpop.f32.mrb[38].mxu0 }
 0x88e   :  { %v2165_v12 = vadd.f32 %v2091_v6, %v4718_v10  ;;  %v2172_v17 = vadd.f32 %v2161_v9, %v4720_v14  ;;  %v3535_v21 = vpop.f32.mrb[29].mxu1  ;;  %v3570_v37 = vpop.f32.mrb[39].mxu0 }
 0x890   :  { %v2288_v11 = vmul.f32 -1.442695, %v2165_v12  ;;  %v2289_v26 = vmul.f32 -1.442695, %v2172_v17 }
 0x892   :  { %4327 = vpow2.f32 %v2288_v11 }
 0x893   :  { %4329 = vpow2.f32 %v2289_v26 }
 0x89c   :  { %v4328_v57 = vpop.eup %4327 }
 0x89d   :  { %v2169_v8 = vadd.f32 1.0, %v4328_v57  ;;  %v4330_v29 = vpop.eup %4329 }
 0x89e   :  { %v2176_v41 = vadd.f32 1.0, %v4330_v29 }
 0x89f   :  { %4331 = vrcp.f32 %v2169_v8 }
 0x8a0   :  { %4333 = vrcp.f32 %v2176_v41 }
 0x8a9   :  { %v4332_v43 = vpop.eup %4331 }
 0x8aa   :  { %v4334_v46 = vpop.eup %4333 }
 0x8ab   :  { %v2252_v63 = vsub.f32 1.0, %v4334_v46  ;;  %v2254_v51 = vmul.f32 %v4334_v46, %v2024_v25 }
 0x8ad   :  { %v2245_v5 = vpop.f32.mrb[30].mxu1 }
 0x8ae   :  { %v2246_v22 = vadd.f32 %v4337_v34, %v2245_v5  ;;  %v3605_v10 = vpop.f32.mrb[31].mxu1 }
 0x8b0   :  { %v2249_v14 = vmul.f32 %v4332_v43, %v2246_v22 }
 0x8b2   :  { %v2250_v49 = vadd.f32 %v2249_v14, %v5161_v45 }
 0x8b4   :  { %4335 = vtanh.f32 %v2250_v49 }
 0x8be   :  { %v4336_v52 = vpop.eup %4335 }
 0x8bf   :  { %v2253_v7 = vmul.f32 %v4336_v52, %v2252_v63 }
 0x8c1   :  { %v2255_v20 = vadd.f32 %v2254_v51, %v2253_v7 }
 0x8c3   :  { %2256 = vst [vmem:[#allocation8] sm:$0xff] %v2255_v20 }
 0x8c4   :  { %4415 = shalt.err (!%p4412_p0)
}
 0x8c5   :  { %s4416_s14 = scalar_lea.hbm %s5153_s5, 128 }
 0x8c6   :  { %p4417_p1 = scmp.ne.s32.totalorder %s5153_s5, %s4416_s14  ;;  %p4420_p2 = scmp.lt.u32.totalorder %s4416_s14, %s5153_s5 }
 0x8c8   :  { %p4422_p3 = pnand %p4420_p2, %p4417_p1 }
 0x8ca   :  { %4425 = shalt.err (!%p4422_p3)
}
 0x8cb   :  { %2266 = dma.vmem_to_hbm [thread:$0]  %s2264_s11, 128, %s5153_s5, [#allocation4]  }
 0x8cc   :  { %4430 = dma.done.wait [#allocation4], 128  }
 0x8cd   :  { %4431 = vsyncadd [#allocation4], 4294967168 }
 0x8ce   :  { %2270 = vsyncpa [#allocation3], 1 }
 0x8cf   :  { %2271 = vsyncpa [#allocation6], 1 }
 0x8d0   :  { %2272 = vsyncpa [#allocation4], 1 }

</bundles_post_ra>
